<compile_context>
chip_gen: v5e
topology: v5e:2x2
jax: 0.10.0
libtpu: 0.0.40
codegen_flags: <defaults>
</compile_context>

<pallas_src>
import jax
import jax.numpy as jnp
from jax.experimental import pallas as pl
from jax.experimental.pallas import tpu as pltpu

LANE = 128


def _round_up(x, m):
    return ((x + m - 1) // m) * m


def mixed_net_kernel(img_ref, sens_ref,
                     w1_ref, b1_ref, w2_ref, b2_ref,
                     wn_ref, bn_ref,
                     wc1i_ref, wc1n_ref, bc1_ref,
                     wc2_ref, bc2_ref, wc3_ref, bc3_ref,
                     out_ref):
    bf16 = jnp.bfloat16
    img = img_ref[...]          # (TB, C*W*H) bf16
    sens = sens_ref[...]        # (TB, 128)   bf16 (zero-padded sensors)

    # image branch: Linear(C*W*H, 256) + ReLU, Linear(256, 128) + ReLU
    x = jnp.dot(img, w1_ref[...], preferred_element_type=jnp.float32) + b1_ref[...]
    x = jnp.maximum(x, 0.0).astype(bf16)
    x = jnp.dot(x, w2_ref[...], preferred_element_type=jnp.float32) + b2_ref[...]
    x = jnp.maximum(x, 0.0).astype(bf16)          # (TB, 128)

    # numeric branch: Linear(numeric_inputs, 128) + ReLU (K padded to 128)
    y = jnp.dot(sens, wn_ref[...], preferred_element_type=jnp.float32) + bn_ref[...]
    y = jnp.maximum(y, 0.0).astype(bf16)          # (TB, 128)

    # combined branch. Concat(x, y) @ wc1 is replaced by a split weight:
    #   z = x @ wc1[:128] + y @ wc1[128:] + bc1   (same math, no lane concat)
    z = (jnp.dot(x, wc1i_ref[...], preferred_element_type=jnp.float32)
         + jnp.dot(y, wc1n_ref[...], preferred_element_type=jnp.float32)
         + bc1_ref[...])
    z = jnp.maximum(z, 0.0).astype(bf16)
    z = jnp.dot(z, wc2_ref[...], preferred_element_type=jnp.float32) + bc2_ref[...]
    z = jnp.maximum(z, 0.0).astype(bf16)
    # output layer padded to 128 lanes (lane-dense store); wrapper slices back.
    z = jnp.dot(z, wc3_ref[...], preferred_element_type=jnp.float32) + bc3_ref[...]
    out_ref[...] = z.astype(out_ref.dtype)


def init_params(key, image_size, numeric_inputs, outputs):
    """Deterministic synthetic f32 params (PyTorch-like layout): weights (in, out), biases (1, out)."""
    C, W, H = image_size
    d_img = C * W * H
    dims = [
        (d_img, 256),              # image fc1
        (256, 128),                # image fc2
        (numeric_inputs, 128),     # numeric fc
        (256, 256),                # combined fc1
        (256, 256),                # combined fc2
        (256, outputs),            # combined fc3
    ]
    params = []
    for (din, dout) in dims:
        key, kw, kb = jax.random.split(key, 3)
        scale = 1.0 / jnp.sqrt(jnp.float32(din))
        w = jax.random.uniform(kw, (din, dout), jnp.float32, -scale, scale)
        b = jax.random.uniform(kb, (1, dout), jnp.float32, -scale, scale)
        params.append((w, b))
    return params


def prepare_kernel_params(params, numeric_inputs, outputs):
    """Cast weights to bf16, split wc1, pad wn rows to 128 and wc3/bc3 cols to 128."""
    (w1, b1), (w2, b2), (wn, bn), (wc1, bc1), (wc2, bc2), (wc3, bc3) = params
    bf16 = jnp.bfloat16

    k_pad = _round_up(numeric_inputs, LANE)
    wn_p = jnp.zeros((k_pad, wn.shape[1]), jnp.float32).at[:numeric_inputs].set(wn)

    out_pad = _round_up(outputs, LANE)
    wc3_p = jnp.zeros((wc3.shape[0], out_pad), jnp.float32).at[:, :outputs].set(wc3)
    bc3_p = jnp.zeros((1, out_pad), jnp.float32).at[:, :outputs].set(bc3)

    wc1_img = wc1[:128]    # rows for x (image features)  -> matches cat((x, y)) order
    wc1_num = wc1[128:]    # rows for y (numeric features)

    return (
        w1.astype(bf16), b1,
        w2.astype(bf16), b2,
        wn_p.astype(bf16), bn,
        wc1_img.astype(bf16), wc1_num.astype(bf16), bc1,
        wc2.astype(bf16), bc2,
        wc3_p.astype(bf16), bc3_p,
    )


def mixed_network_forward(obs, params, image_size, numeric_inputs, outputs):
    C, W, H = image_size
    B = obs.shape[0]
    d_img = C * W * H
    bf16 = jnp.bfloat16

    # split_obs: first C channels are the image, last channel carries the sensor vector
    img_flat = obs[:, :C].reshape(B, d_img).astype(bf16)
    sens = obs[:, C:C + 1].reshape(B, -1)[:, :numeric_inputs]

    # pad sensors to a lane-aligned K (zeros contribute nothing to the matmul)
    k_pad = _round_up(numeric_inputs, LANE)
    sens_p = jnp.zeros((B, k_pad), jnp.float32).at[:, :numeric_inputs].set(sens).astype(bf16)

    # batch tiling: pad B up to a multiple of TB, grid over batch tiles
    TB = 512 if B >= 512 else _round_up(B, 8)
    B_pad = _round_up(B, TB)
    if B_pad != B:
        img_flat = jnp.pad(img_flat, ((0, B_pad - B), (0, 0)))
        sens_p = jnp.pad(sens_p, ((0, B_pad - B), (0, 0)))
    n_tiles = B_pad // TB

    kp = prepare_kernel_params(params, numeric_inputs, outputs)
    out_pad = _round_up(outputs, LANE)

    def row_spec(d):
        return pl.BlockSpec((TB, d), lambda i: (i, 0))

    def full_spec(arr):
        return pl.BlockSpec(arr.shape, lambda i: (0, 0))

    in_specs = [row_spec(d_img), row_spec(k_pad)] + [full_spec(a) for a in kp]

    out = pl.pallas_call(
        mixed_net_kernel,
        out_shape=jax.ShapeDtypeStruct((B_pad, out_pad), jnp.float32),
        grid=(n_tiles,),
        in_specs=in_specs,
        out_specs=pl.BlockSpec((TB, out_pad), lambda i: (i, 0)),
        compiler_params=pltpu.CompilerParams(
            dimension_semantics=("parallel",)),
    )(img_flat, sens_p, *kp)

    return out[:B, :outputs]


def reference_forward(obs, params, image_size, numeric_inputs, outputs):
    """Pure-JAX reference mirroring the PyTorch forward (bf16 matmul inputs, f32 accumulation)."""
    C, W, H = image_size
    B = obs.shape[0]
    bf16 = jnp.bfloat16
    img = obs[:, :C].reshape(B, C * W * H)
    sens = obs[:, C:C + 1].reshape(B, -1)[:, :numeric_inputs]
    (w1, b1), (w2, b2), (wn, bn), (wc1, bc1), (wc2, bc2), (wc3, bc3) = params

    def lin(x, w, b):
        return jnp.dot(x.astype(bf16), w.astype(bf16),
                       preferred_element_type=jnp.float32) + b

    x = jnp.maximum(lin(img, w1, b1), 0.0)
    x = jnp.maximum(lin(x, w2, b2), 0.0)
    y = jnp.maximum(lin(sens, wn, bn), 0.0)
    z = jnp.concatenate([x, y], axis=1)
    z = jnp.maximum(lin(z, wc1, bc1), 0.0)
    z = jnp.maximum(lin(z, wc2, bc2), 0.0)
    return lin(z, wc3, bc3)


if __name__ == "__main__":
    # small shapes: rgb image 3x16x16 + 1 sensor channel, 100 sensors, 10 outputs
    image_size = (3, 16, 16)        # (channel, width, height)
    numeric_inputs = 100
    outputs = 10
    B = 2

    key = jax.random.PRNGKey(0)
    key, k_obs = jax.random.split(key)
    # observation: (B, C_img + 1, H, W) — last channel carries the sensor vector
    obs = jax.random.normal(
        k_obs, (B, image_size[0] + 1, image_size[1], image_size[2]), dtype=jnp.float32)

    params = init_params(key, image_size, numeric_inputs, outputs)

    out = mixed_network_forward(obs, params, image_size, numeric_inputs, outputs)
    out = jax.block_until_ready(out)

    ref = reference_forward(obs, params, image_size, numeric_inputs, outputs)
    assert out.shape == (B, outputs)
    assert jnp.allclose(out, ref, atol=2e-2, rtol=2e-2), (
        f"max abs err = {jnp.max(jnp.abs(out - ref))}")

    print("KERNEL_OK")
</pallas_src>

<mosaic_0001>
module attributes {stable_mosaic.version = 11 : i64} {
  func.func @mixed_net_kernel(%arg0: i32, %arg1: memref<8x768xbf16, #tpu.memory_space<vmem>>, %arg2: memref<8x128xbf16, #tpu.memory_space<vmem>>, %arg3: memref<768x256xbf16, #tpu.memory_space<vmem>>, %arg4: memref<1x256xf32, #tpu.memory_space<vmem>>, %arg5: memref<256x128xbf16, #tpu.memory_space<vmem>>, %arg6: memref<1x128xf32, #tpu.memory_space<vmem>>, %arg7: memref<128x128xbf16, #tpu.memory_space<vmem>>, %arg8: memref<1x128xf32, #tpu.memory_space<vmem>>, %arg9: memref<128x256xbf16, #tpu.memory_space<vmem>>, %arg10: memref<128x256xbf16, #tpu.memory_space<vmem>>, %arg11: memref<1x256xf32, #tpu.memory_space<vmem>>, %arg12: memref<256x256xbf16, #tpu.memory_space<vmem>>, %arg13: memref<1x256xf32, #tpu.memory_space<vmem>>, %arg14: memref<256x128xbf16, #tpu.memory_space<vmem>>, %arg15: memref<1x128xf32, #tpu.memory_space<vmem>>, %arg16: memref<8x128xf32, #tpu.memory_space<vmem>>) attributes {dimension_semantics = [#tpu.dimension_semantics<parallel>], iteration_bounds = array<i64: 1>, scalar_prefetch = 0 : i64, scratch_operands = 0 : i64, tpu.core_type = #tpu.core_type<tc>, window_params = [{transform_indices = @transform_0, window_bounds = array<i64: 8, 768>}, {transform_indices = @transform_1, window_bounds = array<i64: 8, 128>}, {pipeline_mode = #tpu.pipeline_mode<synchronous>, transform_indices = @transform_2, window_bounds = array<i64: 768, 256>}, {pipeline_mode = #tpu.pipeline_mode<synchronous>, transform_indices = @transform_3, window_bounds = array<i64: 1, 256>}, {pipeline_mode = #tpu.pipeline_mode<synchronous>, transform_indices = @transform_4, window_bounds = array<i64: 256, 128>}, {pipeline_mode = #tpu.pipeline_mode<synchronous>, transform_indices = @transform_5, window_bounds = array<i64: 1, 128>}, {pipeline_mode = #tpu.pipeline_mode<synchronous>, transform_indices = @transform_6, window_bounds = array<i64: 128, 128>}, {pipeline_mode = #tpu.pipeline_mode<synchronous>, transform_indices = @transform_7, window_bounds = array<i64: 1, 128>}, {pipeline_mode = #tpu.pipeline_mode<synchronous>, transform_indices = @transform_8, window_bounds = array<i64: 128, 256>}, {pipeline_mode = #tpu.pipeline_mode<synchronous>, transform_indices = @transform_9, window_bounds = array<i64: 128, 256>}, {pipeline_mode = #tpu.pipeline_mode<synchronous>, transform_indices = @transform_10, window_bounds = array<i64: 1, 256>}, {pipeline_mode = #tpu.pipeline_mode<synchronous>, transform_indices = @transform_11, window_bounds = array<i64: 256, 256>}, {pipeline_mode = #tpu.pipeline_mode<synchronous>, transform_indices = @transform_12, window_bounds = array<i64: 1, 256>}, {pipeline_mode = #tpu.pipeline_mode<synchronous>, transform_indices = @transform_13, window_bounds = array<i64: 256, 128>}, {pipeline_mode = #tpu.pipeline_mode<synchronous>, transform_indices = @transform_14, window_bounds = array<i64: 1, 128>}, {transform_indices = @transform_15, window_bounds = array<i64: 8, 128>}]} {
    %c0 = arith.constant 0 : index
    %c0_0 = arith.constant 0 : index
    %0 = vector.load %arg1[%c0, %c0_0] : memref<8x768xbf16, #tpu.memory_space<vmem>>, vector<8x768xbf16>
    %c0_1 = arith.constant 0 : index
    %c0_2 = arith.constant 0 : index
    %1 = vector.load %arg2[%c0_1, %c0_2] : memref<8x128xbf16, #tpu.memory_space<vmem>>, vector<8x128xbf16>
    %c0_3 = arith.constant 0 : index
    %c0_4 = arith.constant 0 : index
    %2 = vector.load %arg3[%c0_3, %c0_4] : memref<768x256xbf16, #tpu.memory_space<vmem>>, vector<768x256xbf16>
    %cst = arith.constant dense<0.000000e+00> : vector<8x256xf32>
    %3 = tpu.matmul %0, %2, %cst {dimension_numbers = #tpu.dot_dimension_numbers<[1], [0], [0], [1], [0, 0, 1, 1], [], []>} : vector<8x768xbf16>, vector<768x256xbf16>, vector<8x256xf32> -> vector<8x256xf32>
    %c0_5 = arith.constant 0 : index
    %c0_6 = arith.constant 0 : index
    %4 = vector.load %arg4[%c0_5, %c0_6] : memref<1x256xf32, #tpu.memory_space<vmem>>, vector<1x256xf32>
    %5 = vector.broadcast %4 : vector<1x256xf32> to vector<8x256xf32>
    %6 = arith.addf %3, %5 : vector<8x256xf32>
    %cst_7 = arith.constant 0.000000e+00 : f32
    %7 = vector.broadcast %cst_7 : f32 to vector<8x256xf32>
    %8 = arith.maximumf %6, %7 : vector<8x256xf32>
    %9 = arith.truncf %8 : vector<8x256xf32> to vector<8x256xbf16>
    %c0_8 = arith.constant 0 : index
    %c0_9 = arith.constant 0 : index
    %10 = vector.load %arg5[%c0_8, %c0_9] : memref<256x128xbf16, #tpu.memory_space<vmem>>, vector<256x128xbf16>
    %cst_10 = arith.constant dense<0.000000e+00> : vector<8x128xf32>
    %11 = tpu.matmul %9, %10, %cst_10 {dimension_numbers = #tpu.dot_dimension_numbers<[1], [0], [0], [1], [0, 0, 1, 1], [], []>} : vector<8x256xbf16>, vector<256x128xbf16>, vector<8x128xf32> -> vector<8x128xf32>
    %c0_11 = arith.constant 0 : index
    %c0_12 = arith.constant 0 : index
    %12 = vector.load %arg6[%c0_11, %c0_12] : memref<1x128xf32, #tpu.memory_space<vmem>>, vector<1x128xf32>
    %13 = vector.broadcast %12 : vector<1x128xf32> to vector<8x128xf32>
    %14 = arith.addf %11, %13 : vector<8x128xf32>
    %cst_13 = arith.constant 0.000000e+00 : f32
    %15 = vector.broadcast %cst_13 : f32 to vector<8x128xf32>
    %16 = arith.maximumf %14, %15 : vector<8x128xf32>
    %17 = arith.truncf %16 : vector<8x128xf32> to vector<8x128xbf16>
    %c0_14 = arith.constant 0 : index
    %c0_15 = arith.constant 0 : index
    %18 = vector.load %arg7[%c0_14, %c0_15] : memref<128x128xbf16, #tpu.memory_space<vmem>>, vector<128x128xbf16>
    %cst_16 = arith.constant dense<0.000000e+00> : vector<8x128xf32>
    %19 = tpu.matmul %1, %18, %cst_16 {dimension_numbers = #tpu.dot_dimension_numbers<[1], [0], [0], [1], [0, 0, 1, 1], [], []>} : vector<8x128xbf16>, vector<128x128xbf16>, vector<8x128xf32> -> vector<8x128xf32>
    %c0_17 = arith.constant 0 : index
    %c0_18 = arith.constant 0 : index
    %20 = vector.load %arg8[%c0_17, %c0_18] : memref<1x128xf32, #tpu.memory_space<vmem>>, vector<1x128xf32>
    %21 = vector.broadcast %20 : vector<1x128xf32> to vector<8x128xf32>
    %22 = arith.addf %19, %21 : vector<8x128xf32>
    %cst_19 = arith.constant 0.000000e+00 : f32
    %23 = vector.broadcast %cst_19 : f32 to vector<8x128xf32>
    %24 = arith.maximumf %22, %23 : vector<8x128xf32>
    %25 = arith.truncf %24 : vector<8x128xf32> to vector<8x128xbf16>
    %c0_20 = arith.constant 0 : index
    %c0_21 = arith.constant 0 : index
    %26 = vector.load %arg9[%c0_20, %c0_21] : memref<128x256xbf16, #tpu.memory_space<vmem>>, vector<128x256xbf16>
    %cst_22 = arith.constant dense<0.000000e+00> : vector<8x256xf32>
    %27 = tpu.matmul %17, %26, %cst_22 {dimension_numbers = #tpu.dot_dimension_numbers<[1], [0], [0], [1], [0, 0, 1, 1], [], []>} : vector<8x128xbf16>, vector<128x256xbf16>, vector<8x256xf32> -> vector<8x256xf32>
    %c0_23 = arith.constant 0 : index
    %c0_24 = arith.constant 0 : index
    %28 = vector.load %arg10[%c0_23, %c0_24] : memref<128x256xbf16, #tpu.memory_space<vmem>>, vector<128x256xbf16>
    %cst_25 = arith.constant dense<0.000000e+00> : vector<8x256xf32>
    %29 = tpu.matmul %25, %28, %cst_25 {dimension_numbers = #tpu.dot_dimension_numbers<[1], [0], [0], [1], [0, 0, 1, 1], [], []>} : vector<8x128xbf16>, vector<128x256xbf16>, vector<8x256xf32> -> vector<8x256xf32>
    %30 = arith.addf %27, %29 : vector<8x256xf32>
    %c0_26 = arith.constant 0 : index
    %c0_27 = arith.constant 0 : index
    %31 = vector.load %arg11[%c0_26, %c0_27] : memref<1x256xf32, #tpu.memory_space<vmem>>, vector<1x256xf32>
    %32 = vector.broadcast %31 : vector<1x256xf32> to vector<8x256xf32>
    %33 = arith.addf %30, %32 : vector<8x256xf32>
    %cst_28 = arith.constant 0.000000e+00 : f32
    %34 = vector.broadcast %cst_28 : f32 to vector<8x256xf32>
    %35 = arith.maximumf %33, %34 : vector<8x256xf32>
    %36 = arith.truncf %35 : vector<8x256xf32> to vector<8x256xbf16>
    %c0_29 = arith.constant 0 : index
    %c0_30 = arith.constant 0 : index
    %37 = vector.load %arg12[%c0_29, %c0_30] : memref<256x256xbf16, #tpu.memory_space<vmem>>, vector<256x256xbf16>
    %cst_31 = arith.constant dense<0.000000e+00> : vector<8x256xf32>
    %38 = tpu.matmul %36, %37, %cst_31 {dimension_numbers = #tpu.dot_dimension_numbers<[1], [0], [0], [1], [0, 0, 1, 1], [], []>} : vector<8x256xbf16>, vector<256x256xbf16>, vector<8x256xf32> -> vector<8x256xf32>
    %c0_32 = arith.constant 0 : index
    %c0_33 = arith.constant 0 : index
    %39 = vector.load %arg13[%c0_32, %c0_33] : memref<1x256xf32, #tpu.memory_space<vmem>>, vector<1x256xf32>
    %40 = vector.broadcast %39 : vector<1x256xf32> to vector<8x256xf32>
    %41 = arith.addf %38, %40 : vector<8x256xf32>
    %cst_34 = arith.constant 0.000000e+00 : f32
    %42 = vector.broadcast %cst_34 : f32 to vector<8x256xf32>
    %43 = arith.maximumf %41, %42 : vector<8x256xf32>
    %44 = arith.truncf %43 : vector<8x256xf32> to vector<8x256xbf16>
    %c0_35 = arith.constant 0 : index
    %c0_36 = arith.constant 0 : index
    %45 = vector.load %arg14[%c0_35, %c0_36] : memref<256x128xbf16, #tpu.memory_space<vmem>>, vector<256x128xbf16>
    %cst_37 = arith.constant dense<0.000000e+00> : vector<8x128xf32>
    %46 = tpu.matmul %44, %45, %cst_37 {dimension_numbers = #tpu.dot_dimension_numbers<[1], [0], [0], [1], [0, 0, 1, 1], [], []>} : vector<8x256xbf16>, vector<256x128xbf16>, vector<8x128xf32> -> vector<8x128xf32>
    %c0_38 = arith.constant 0 : index
    %c0_39 = arith.constant 0 : index
    %47 = vector.load %arg15[%c0_38, %c0_39] : memref<1x128xf32, #tpu.memory_space<vmem>>, vector<1x128xf32>
    %48 = vector.broadcast %47 : vector<1x128xf32> to vector<8x128xf32>
    %49 = arith.addf %46, %48 : vector<8x128xf32>
    %c0_40 = arith.constant 0 : index
    %c0_41 = arith.constant 0 : index
    %50 = vector.load %arg16[%c0_40, %c0_41] : memref<8x128xf32, #tpu.memory_space<vmem>>, vector<8x128xf32>
    tpu.vector_store %arg16[%c0_40, %c0_41], %49 {strides = array<i32>} : memref<8x128xf32, #tpu.memory_space<vmem>>, vector<8x128xf32>,
    return
  }
  func.func @transform_0(%arg0: i32) -> (i32, i32) {
    %c0_i32 = arith.constant 0 : i32
    %c0_i32_0 = arith.constant 0 : i32
    return %arg0, %c0_i32 : i32, i32
  }
  func.func @transform_1(%arg0: i32) -> (i32, i32) {
    %c0_i32 = arith.constant 0 : i32
    %c0_i32_0 = arith.constant 0 : i32
    return %arg0, %c0_i32 : i32, i32
  }
  func.func @transform_2(%arg0: i32) -> (i32, i32) {
    %c0_i32 = arith.constant 0 : i32
    %c0_i32_0 = arith.constant 0 : i32
    %c0_i32_1 = arith.constant 0 : i32
    return %c0_i32, %c0_i32_0 : i32, i32
  }
  func.func @transform_3(%arg0: i32) -> (i32, i32) {
    %c0_i32 = arith.constant 0 : i32
    %c0_i32_0 = arith.constant 0 : i32
    %c0_i32_1 = arith.constant 0 : i32
    return %c0_i32, %c0_i32_0 : i32, i32
  }
  func.func @transform_4(%arg0: i32) -> (i32, i32) {
    %c0_i32 = arith.constant 0 : i32
    %c0_i32_0 = arith.constant 0 : i32
    %c0_i32_1 = arith.constant 0 : i32
    return %c0_i32, %c0_i32_0 : i32, i32
  }
  func.func @transform_5(%arg0: i32) -> (i32, i32) {
    %c0_i32 = arith.constant 0 : i32
    %c0_i32_0 = arith.constant 0 : i32
    %c0_i32_1 = arith.constant 0 : i32
    return %c0_i32, %c0_i32_0 : i32, i32
  }
  func.func @transform_6(%arg0: i32) -> (i32, i32) {
    %c0_i32 = arith.constant 0 : i32
    %c0_i32_0 = arith.constant 0 : i32
    %c0_i32_1 = arith.constant 0 : i32
    return %c0_i32, %c0_i32_0 : i32, i32
  }
  func.func @transform_7(%arg0: i32) -> (i32, i32) {
    %c0_i32 = arith.constant 0 : i32
    %c0_i32_0 = arith.constant 0 : i32
    %c0_i32_1 = arith.constant 0 : i32
    return %c0_i32, %c0_i32_0 : i32, i32
  }
  func.func @transform_8(%arg0: i32) -> (i32, i32) {
    %c0_i32 = arith.constant 0 : i32
    %c0_i32_0 = arith.constant 0 : i32
    %c0_i32_1 = arith.constant 0 : i32
    return %c0_i32, %c0_i32_0 : i32, i32
  }
  func.func @transform_9(%arg0: i32) -> (i32, i32) {
    %c0_i32 = arith.constant 0 : i32
    %c0_i32_0 = arith.constant 0 : i32
    %c0_i32_1 = arith.constant 0 : i32
    return %c0_i32, %c0_i32_0 : i32, i32
  }
  func.func @transform_10(%arg0: i32) -> (i32, i32) {
    %c0_i32 = arith.constant 0 : i32
    %c0_i32_0 = arith.constant 0 : i32
    %c0_i32_1 = arith.constant 0 : i32
    return %c0_i32, %c0_i32_0 : i32, i32
  }
  func.func @transform_11(%arg0: i32) -> (i32, i32) {
    %c0_i32 = arith.constant 0 : i32
    %c0_i32_0 = arith.constant 0 : i32
    %c0_i32_1 = arith.constant 0 : i32
    return %c0_i32, %c0_i32_0 : i32, i32
  }
  func.func @transform_12(%arg0: i32) -> (i32, i32) {
    %c0_i32 = arith.constant 0 : i32
    %c0_i32_0 = arith.constant 0 : i32
    %c0_i32_1 = arith.constant 0 : i32
    return %c0_i32, %c0_i32_0 : i32, i32
  }
  func.func @transform_13(%arg0: i32) -> (i32, i32) {
    %c0_i32 = arith.constant 0 : i32
    %c0_i32_0 = arith.constant 0 : i32
    %c0_i32_1 = arith.constant 0 : i32
    return %c0_i32, %c0_i32_0 : i32, i32
  }
  func.func @transform_14(%arg0: i32) -> (i32, i32) {
    %c0_i32 = arith.constant 0 : i32
    %c0_i32_0 = arith.constant 0 : i32
    %c0_i32_1 = arith.constant 0 : i32
    return %c0_i32, %c0_i32_0 : i32, i32
  }
  func.func @transform_15(%arg0: i32) -> (i32, i32) {
    %c0_i32 = arith.constant 0 : i32
    %c0_i32_0 = arith.constant 0 : i32
    return %arg0, %c0_i32 : i32, i32
  }
}

</mosaic_0001>

<bundles_post_ra>
// kernel: tpu_custom_call.1
= control target key start
LH: loop header
LB: loop body
LE: loop exit
PB: predicated region body
PF: predicated region fallthrough
CT: control target
= control target key end

     0   :  { %20 = vsyncpa [#allocation3], 0  ;;  %s3431_s0 = inlined_call_operand.hbm [shape: bf16[8,768], index: 0, kind: input, shape index: {}]   ;;  %s3432_s1 = inlined_call_operand.hbm [shape: bf16[8,128], index: 1, kind: input, shape index: {}]   ;;  %s3433_s2 = inlined_call_operand.hbm [shape: bf16[768,256], index: 2, kind: input, shape index: {}]   ;;  %s3434_s3 = inlined_call_operand.vmem [shape: f32[1,256], index: 3, kind: input, shape index: {}]   ;;  %s3435_s4 = inlined_call_operand.hbm [shape: bf16[256,128], index: 4, kind: input, shape index: {}]   ;;  %s3436_s5 = inlined_call_operand.hbm [shape: f32[1,128], index: 5, kind: input, shape index: {}]   ;;  %s3437_s6 = inlined_call_operand.hbm [shape: bf16[128,128], index: 6, kind: input, shape index: {}]   ;;  %s3438_s7 = inlined_call_operand.hbm [shape: f32[1,128], index: 7, kind: input, shape index: {}]   ;;  %s3439_s8 = inlined_call_operand.hbm [shape: bf16[128,256], index: 8, kind: input, shape index: {}]   ;;  %s3440_s9 = inlined_call_operand.hbm [shape: bf16[128,256], index: 9, kind: input, shape index: {}]   ;;  %s3441_s10 = inlined_call_operand.vmem [shape: f32[1,256], index: 10, kind: input, shape index: {}]   ;;  %s3442_s11 = inlined_call_operand.hbm [shape: bf16[256,256], index: 11, kind: input, shape index: {}]   ;;  %s3443_s12 = inlined_call_operand.vmem [shape: f32[1,256], index: 12, kind: input, shape index: {}]   ;;  %s3444_s13 = inlined_call_operand.hbm [shape: bf16[256,128], index: 13, kind: input, shape index: {}]   ;;  %s3445_s14 = inlined_call_operand.vmem [shape: f32[1,128], index: 14, kind: input, shape index: {}]   ;;  %s3446_s15 = inlined_call_operand.hbm [shape: f32[8,128], index: 15, kind: output, shape index: {}]  }
   0x1   :  { %21 = vsyncpa [#allocation6], 0 }
   0x2   :  { %22 = vsyncpa [#allocation9], 0 }
   0x3   :  { %23 = vsyncpa [#allocation12], 0 }
   0x4   :  { %24 = vsyncpa [#allocation15], 0 }
   0x5   :  { %25 = vsyncpa [#allocation18], 0  ;;  %s43_s20 = sshll.u32 %s3432_s1, 4  ;;  %s44_s20 = int_to_ptr.hbm [resolvable:$true] %s43_s20 }
   0x6   :  { %26 = vsyncpa [#allocation4], 0  ;;  %s3236_s21 = smov [#allocation5]   ;;  %s68_s25 = sshll.u32 %s3435_s4, 4  ;;  %s69_s25 = int_to_ptr.hbm [resolvable:$true] %s68_s25 }
   0x7   :  { %s45_s22 = sshll.u32 %s3236_s21, 4  ;;  %s3237_s26 = smov [#allocation8]   ;;  %s46_s22 = int_to_ptr.vmem [resolvable:$true] %s45_s22 }
   0x8   :  { %48 = dma.hbm_to_vmem [thread:$0]  %s44_s20, 64, %s46_s22, [#allocation6]  }
   0x9   :  { %s70_s27 = sshll.u32 %s3237_s26, 4  ;;  %s3238_s28 = smov 64   ;;  %s71_s27 = int_to_ptr.vmem [resolvable:$true] %s70_s27 }
   0xa   :  { %s3239_s29 = smov 4   ;;  %s92_s16 = sshll.u32 %s3437_s6, 4  ;;  %s93_s16 = int_to_ptr.hbm [resolvable:$true] %s92_s16 }
   0xb   :  { %76 = dma.hbm_to_vmem [thread:$0]  %s69_s25, 2048, %s71_s27, [#allocation9], %s3238_s28, %s3238_s28, %s3239_s29  }
   0xc   :  { %s3240_s17 = smov [#allocation11]   ;;  %s116_s20 = sshll.u32 %s3439_s8, 4  ;;  %s117_s20 = int_to_ptr.hbm [resolvable:$true] %s116_s20 }
   0xd   :  { %s94_s18 = sshll.u32 %s3240_s17, 4  ;;  %s3241_s21 = smov [#allocation14]   ;;  %s95_s18 = int_to_ptr.vmem [resolvable:$true] %s94_s18 }
   0xe   :  { %100 = dma.hbm_to_vmem [thread:$0]  %s93_s16, 1024, %s95_s18, [#allocation12], %s3238_s28, %s3238_s28, %s3239_s29  }
   0xf   :  { %s118_s22 = sshll.u32 %s3241_s21, 4  ;;  %s144_s25 = sshll.u32 %s3442_s11, 4  ;;  %s119_s22 = int_to_ptr.vmem [resolvable:$true] %s118_s22  ;;  %s145_s25 = int_to_ptr.hbm [resolvable:$true] %s144_s25 }
  0x10   :  { %s3242_s6 = smov 128   ;;  %s3243_s26 = smov 8  }
  0x11   :  { %124 = dma.hbm_to_vmem [thread:$0]  %s117_s20, 2048, %s119_s22, [#allocation15], %s3242_s6, %s3242_s6, %s3243_s26  }
  0x12   :  { %s32_s30 = sshll.u32 %s3431_s0, 4  ;;  %s3244_s8 = smov [#allocation17]   ;;  %s33_s30 = int_to_ptr.hbm [resolvable:$true] %s32_s30 }
  0x13   :  { %s146_s16 = sshll.u32 %s3244_s8, 4  ;;  %s3245_s11 = smov [#allocation2]   ;;  %s147_s16 = int_to_ptr.vmem [resolvable:$true] %s146_s16 }
  0x14   :  { %152 = dma.hbm_to_vmem [thread:$0]  %s145_s25, 4096, %s147_s16, [#allocation18], %s3242_s6, %s3242_s6, %s3243_s26  }
  0x15   :  { %s34_s17 = sshll.u32 %s3245_s11, 4  ;;  %s53_s19 = sshll.u32 %s3433_s2, 4  ;;  %s35_s17 = int_to_ptr.vmem [resolvable:$true] %s34_s17  ;;  %s54_s19 = int_to_ptr.hbm [resolvable:$true] %s53_s19 }
  0x16   :  { %37 = dma.hbm_to_vmem [thread:$0]  %s33_s30, 384, %s35_s17, [#allocation3]  }
  0x17   :  { %s82_s0 = sshll.u32 %s3436_s5, 4  ;;  %s3246_s22 = smov [#allocation7]   ;;  %s83_s0 = int_to_ptr.hbm [resolvable:$true] %s82_s0 }
  0x18   :  { %s55_s23 = sshll.u32 %s3246_s22, 4  ;;  %s3247_s24 = smov [#allocation10]   ;;  %s56_s23 = int_to_ptr.vmem [resolvable:$true] %s55_s23 }
  0x19   :  { %61 = dma.hbm_to_vmem [thread:$0]  %s54_s19, 12288, %s56_s23, [#allocation6], %s3242_s6, %s3242_s6, %s3243_s26  }
  0x1a   :  { %s84_s25 = sshll.u32 %s3247_s24, 4  ;;  %s106_s2 = sshll.u32 %s3438_s7, 4  ;;  %s85_s25 = int_to_ptr.vmem [resolvable:$true] %s84_s25  ;;  %s107_s2 = int_to_ptr.hbm [resolvable:$true] %s106_s2 }
  0x1b   :  { %87 = dma.hbm_to_vmem [thread:$0]  %s83_s0, 16, %s85_s25, [#allocation9]  }
  0x1c   :  { %s129_s5 = sshll.u32 %s3440_s9, 4  ;;  %s3248_s16 = smov [#allocation13]   ;;  %s130_s5 = int_to_ptr.hbm [resolvable:$true] %s129_s5 }
  0x1d   :  { %s108_s11 = sshll.u32 %s3248_s16, 4  ;;  %s3249_s17 = smov [#allocation16]   ;;  %s109_s11 = int_to_ptr.vmem [resolvable:$true] %s108_s11 }
  0x1e   :  { %111 = dma.hbm_to_vmem [thread:$0]  %s107_s2, 16, %s109_s11, [#allocation12]  }
  0x1f   :  { %s131_s18 = sshll.u32 %s3249_s17, 4  ;;  %s159_s20 = sshll.u32 %s3444_s13, 4  ;;  %s132_s18 = int_to_ptr.vmem [resolvable:$true] %s131_s18  ;;  %s160_s20 = int_to_ptr.hbm [resolvable:$true] %s159_s20 }
  0x20   :  { %137 = dma.hbm_to_vmem [thread:$0]  %s130_s5, 2048, %s132_s18, [#allocation15], %s3242_s6, %s3242_s6, %s3243_s26  }
  0x21   :  { %s3250_s7 = smov [#allocation19]  }
  0x22   :  { %s161_s21 = sshll.u32 %s3250_s7, 4  ;;  %s162_s21 = int_to_ptr.vmem [resolvable:$true] %s161_s21 }
  0x23   :  { %167 = dma.hbm_to_vmem [thread:$0]  %s160_s20, 2048, %s162_s21, [#allocation18], %s3238_s28, %s3238_s28, %s3239_s29  }
  0x24   :  { %3222 = dma.done.wait [#allocation3], 384  }
  0x25   :  { %3223 = vsyncadd [#allocation3], 4294966912 }
  0x26   :  { %3224 = dma.done.wait [#allocation6], 12352  }
  0x27   :  { %3225 = vsyncadd [#allocation6], 4294954944 }
  0x28   :  { %3226 = dma.done.wait [#allocation9], 2064  }
  0x29   :  { %3227 = vsyncadd [#allocation9], 4294965232 }
  0x2a   :  { %3228 = dma.done.wait [#allocation12], 1040  }
  0x2b   :  { %3229 = vsyncadd [#allocation12], 4294966256 }
  0x2c   :  { %3230 = dma.done.wait [#allocation15], 4096  }
  0x2d   :  { %3231 = vsyncadd [#allocation15], 4294963200 }
  0x2e   :  { %3232 = dma.done.wait [#allocation18], 6144  }
  0x2f   :  { %3233 = vsyncadd [#allocation18], 4294961152  ;;  %v1973_v0 = vld [vmem:[#allocation7 + $0x70] sm:$0xf]  ;;  %v2730_v1 = vld [vmem:[#allocation7 + $0x74] sm:$0xf0] }
  0x30   :  { %v2037_v2 = vld [vmem:[#allocation7 + $0xf0] sm:$0xf]  ;;  %v1974_v3 = vor.u32 %v2730_v1, %v1973_v0  ;;  %v2746_v4 = vld [vmem:[#allocation7 + $0xf4] sm:$0xf0]  ;;  %v1965_v11 = vld [vmem:[#allocation7 + $0x60] sm:$0xf] }
  0x31   :  { %v2101_v5 = vld [vmem:[#allocation7 + $0x170] sm:$0xf]  ;;  %v2762_v6 = vld [vmem:[#allocation7 + $0x174] sm:$0xf0]  ;;  %v2038_v7 = vor.u32 %v2746_v4, %v2037_v2  ;;  %v2728_v13 = vld [vmem:[#allocation7 + $0x64] sm:$0xf0] }
  0x32   :  { %v2102_v8 = vor.u32 %v2762_v6, %v2101_v5  ;;  %v2165_v9 = vld [vmem:[#allocation7 + $0x1f0] sm:$0xf]  ;;  %v2778_v10 = vld [vmem:[#allocation7 + $0x1f4] sm:$0xf0]  ;;  %821 = vmatpush.bf16.msra.mxu0 %v1974_v3  ;;  %v2029_v14 = vld [vmem:[#allocation7 + $0xe0] sm:$0xf]  ;;  %v1966_v16 = vor.u32 %v2728_v13, %v1965_v11 }
  0x33   :  { %v2166_v12 = vor.u32 %v2778_v10, %v2165_v9  ;;  %v2744_v15 = vld [vmem:[#allocation7 + $0xe4] sm:$0xf0]  ;;  %834 = vmatpush.bf16.msra.mxu1 %v2038_v7  ;;  %v2093_v18 = vld [vmem:[#allocation7 + $0x160] sm:$0xf]  ;;  %v1957_v23 = vld [vmem:[#allocation7 + $0x50] sm:$0xf] }
  0x34   :  { %847 = vmatpush.bf16.msra.mxu2 %v2102_v8  ;;  %v2030_v17 = vor.u32 %v2744_v15, %v2029_v14  ;;  %v2760_v19 = vld [vmem:[#allocation7 + $0x164] sm:$0xf0]  ;;  %v2157_v20 = vld [vmem:[#allocation7 + $0x1e0] sm:$0xf]  ;;  %v2726_v24 = vld [vmem:[#allocation7 + $0x54] sm:$0xf0] }
  0x35   :  { %860 = vmatpush.bf16.msra.mxu3 %v2166_v12  ;;  %v2094_v21 = vor.u32 %v2760_v19, %v2093_v18  ;;  %v2776_v22 = vld [vmem:[#allocation7 + $0x1e4] sm:$0xf0]  ;;  %v2021_v26 = vld [vmem:[#allocation7 + $0xd0] sm:$0xf]  ;;  %v2742_v27 = vld [vmem:[#allocation7 + $0xd4] sm:$0xf0]  ;;  %v1958_v29 = vor.u32 %v2726_v24, %v1957_v23 }
  0x36   :  { %v2158_v25 = vor.u32 %v2776_v22, %v2157_v20  ;;  %v2085_v28 = vld [vmem:[#allocation7 + $0x150] sm:$0xf]  ;;  %822 = vmatpush.bf16.msra.mxu0 %v1966_v16  ;;  %v2758_v30 = vld [vmem:[#allocation7 + $0x154] sm:$0xf0]  ;;  %v2022_v33 = vor.u32 %v2742_v27, %v2021_v26  ;;  %v1949_v35 = vld [vmem:[#allocation7 + $0x40] sm:$0xf] }
  0x37   :  { %v2149_v31 = vld [vmem:[#allocation7 + $0x1d0] sm:$0xf]  ;;  %v2774_v32 = vld [vmem:[#allocation7 + $0x1d4] sm:$0xf0]  ;;  %835 = vmatpush.bf16.msra.mxu1 %v2030_v17  ;;  %v2086_v34 = vor.u32 %v2758_v30, %v2085_v28  ;;  %v2724_v36 = vld [vmem:[#allocation7 + $0x44] sm:$0xf0] }
  0x38   :  { %848 = vmatpush.bf16.msra.mxu2 %v2094_v21  ;;  %v2013_v37 = vld [vmem:[#allocation7 + $0xc0] sm:$0xf]  ;;  %v2150_v38 = vor.u32 %v2774_v32, %v2149_v31  ;;  %v2740_v39 = vld [vmem:[#allocation7 + $0xc4] sm:$0xf0]  ;;  %v1950_v44 = vor.u32 %v2724_v36, %v1949_v35  ;;  %v1941_v47 = vld [vmem:[#allocation7 + $0x30] sm:$0xf] }
  0x39   :  { %861 = vmatpush.bf16.msra.mxu3 %v2158_v25  ;;  %v2077_v40 = vld [vmem:[#allocation7 + $0x140] sm:$0xf]  ;;  %v2756_v41 = vld [vmem:[#allocation7 + $0x144] sm:$0xf0]  ;;  %v2014_v45 = vor.u32 %v2740_v39, %v2013_v37  ;;  %v2722_v48 = vld [vmem:[#allocation7 + $0x34] sm:$0xf0] }
  0x3a   :  { %v2141_v42 = vld [vmem:[#allocation7 + $0x1c0] sm:$0xf]  ;;  %v2772_v43 = vld [vmem:[#allocation7 + $0x1c4] sm:$0xf0]  ;;  %823 = vmatpush.bf16.msra.mxu0 %v1958_v29  ;;  %v2078_v46 = vor.u32 %v2756_v41, %v2077_v40  ;;  %v2005_v49 = vld [vmem:[#allocation7 + $0xb0] sm:$0xf]  ;;  %v1942_v56 = vor.u32 %v2722_v48, %v1941_v47 }
  0x3b   :  { %836 = vmatpush.bf16.msra.mxu1 %v2022_v33  ;;  %v2142_v50 = vor.u32 %v2772_v43, %v2141_v42  ;;  %v2738_v51 = vld [vmem:[#allocation7 + $0xb4] sm:$0xf0]  ;;  %v2069_v52 = vld [vmem:[#allocation7 + $0x130] sm:$0xf]  ;;  %v1933_v59 = vld [vmem:[#allocation7 + $0x20] sm:$0xf] }
  0x3c   :  { %849 = vmatpush.bf16.msra.mxu2 %v2086_v34  ;;  %v2754_v53 = vld [vmem:[#allocation7 + $0x134] sm:$0xf0]  ;;  %v2133_v54 = vld [vmem:[#allocation7 + $0x1b0] sm:$0xf]  ;;  %v2006_v57 = vor.u32 %v2738_v51, %v2005_v49  ;;  %v2720_v60 = vld [vmem:[#allocation7 + $0x24] sm:$0xf0] }
  0x3d   :  { %862 = vmatpush.bf16.msra.mxu3 %v2150_v38  ;;  %v2770_v55 = vld [vmem:[#allocation7 + $0x1b4] sm:$0xf0]  ;;  %v2070_v58 = vor.u32 %v2754_v53, %v2069_v52  ;;  %v1997_v61 = vld [vmem:[#allocation7 + $0xa0] sm:$0xf]  ;;  %v2736_v63 = vld [vmem:[#allocation7 + $0xa4] sm:$0xf0]  ;;  %v1934_v4 = vor.u32 %v2720_v60, %v1933_v59 }
  0x3e   :  { %824 = vmatpush.bf16.msra.mxu0 %v1950_v44  ;;  %v2134_v62 = vor.u32 %v2770_v55, %v2133_v54  ;;  %v2061_v0 = vld [vmem:[#allocation7 + $0x120] sm:$0xf]  ;;  %v2752_v1 = vld [vmem:[#allocation7 + $0x124] sm:$0xf0]  ;;  %v1998_v5 = vor.u32 %v2736_v63, %v1997_v61  ;;  %v1925_v7 = vld [vmem:[#allocation7 + $0x10] sm:$0xf] }
  0x3f   :  { %837 = vmatpush.bf16.msra.mxu1 %v2014_v45  ;;  %v2125_v2 = vld [vmem:[#allocation7 + $0x1a0] sm:$0xf]  ;;  %v2768_v3 = vld [vmem:[#allocation7 + $0x1a4] sm:$0xf0]  ;;  %v2062_v6 = vor.u32 %v2752_v1, %v2061_v0  ;;  %v2718_v8 = vld [vmem:[#allocation7 + $0x14] sm:$0xf0] }
  0x40   :  { %850 = vmatpush.bf16.msra.mxu2 %v2078_v46  ;;  %v1989_v9 = vld [vmem:[#allocation7 + $0x90] sm:$0xf]  ;;  %v2126_v10 = vor.u32 %v2768_v3, %v2125_v2  ;;  %v2734_v11 = vld [vmem:[#allocation7 + $0x94] sm:$0xf0]  ;;  %v1926_v16 = vor.u32 %v2718_v8, %v1925_v7  ;;  %v1917_v17 = vld [vmem:[#allocation7] sm:$0xf] }
  0x41   :  { %863 = vmatpush.bf16.msra.mxu3 %v2142_v50  ;;  %v2053_v12 = vld [vmem:[#allocation7 + $0x110] sm:$0xf]  ;;  %v2750_v13 = vld [vmem:[#allocation7 + $0x114] sm:$0xf0]  ;;  %v2716_v18 = vld [vmem:[#allocation7 + $0x4] sm:$0xf0]  ;;  %v1990_v19 = vor.u32 %v2734_v11, %v1989_v9 }
  0x42   :  { %825 = vmatpush.bf16.msra.mxu0 %v1942_v56  ;;  %v2117_v14 = vld [vmem:[#allocation7 + $0x190] sm:$0xf]  ;;  %v2766_v15 = vld [vmem:[#allocation7 + $0x194] sm:$0xf0]  ;;  %v2054_v20 = vor.u32 %v2750_v13, %v2053_v12  ;;  %v1981_v21 = vld [vmem:[#allocation7 + $0x80] sm:$0xf]  ;;  %v1918_v31 = vor.u32 %v2716_v18, %v1917_v17 }
  0x43   :  { %838 = vmatpush.bf16.msra.mxu1 %v2006_v57  ;;  %v2732_v22 = vld [vmem:[#allocation7 + $0x84] sm:$0xf0]  ;;  %v2045_v23 = vld [vmem:[#allocation7 + $0x100] sm:$0xf]  ;;  %v2118_v24 = vor.u32 %v2766_v15, %v2117_v14  ;;  %v2229_v28 = vld [vmem:[#allocation7 + $0x270] sm:$0xf] }
  0x44   :  { %851 = vmatpush.bf16.msra.mxu2 %v2070_v58  ;;  %v2748_v25 = vld [vmem:[#allocation7 + $0x104] sm:$0xf0]  ;;  %v2109_v26 = vld [vmem:[#allocation7 + $0x180] sm:$0xf]  ;;  %v2794_v29 = vld [vmem:[#allocation7 + $0x274] sm:$0xf0]  ;;  %v1982_v35 = vor.u32 %v2732_v22, %v1981_v21 }
  0x45   :  { %864 = vmatpush.bf16.msra.mxu3 %v2134_v62  ;;  %v2764_v27 = vld [vmem:[#allocation7 + $0x184] sm:$0xf0]  ;;  %v2293_v30 = vld [vmem:[#allocation7 + $0x2f0] sm:$0xf]  ;;  %v2810_v32 = vld [vmem:[#allocation7 + $0x2f4] sm:$0xf0]  ;;  %v2046_v36 = vor.u32 %v2748_v25, %v2045_v23  ;;  %v2230_v40 = vor.u32 %v2794_v29, %v2229_v28 }
  0x46   :  { %826 = vmatpush.bf16.msra.mxu0 %v1934_v4  ;;  %v2729_v33 = vld [vmem:[#allocation7 + $0x74] sm:$0xf]  ;;  %v1975_v34 = vld [vmem:[#allocation7 + $0x78] sm:$0xf0]  ;;  %v2110_v39 = vor.u32 %v2764_v27, %v2109_v26  ;;  %v2294_v41 = vor.u32 %v2810_v32, %v2293_v30  ;;  %v2221_v43 = vld [vmem:[#allocation7 + $0x260] sm:$0xf] }
  0x47   :  { %839 = vmatpush.bf16.msra.mxu1 %v1998_v5  ;;  %v2745_v37 = vld [vmem:[#allocation7 + $0xf4] sm:$0xf]  ;;  %v2039_v38 = vld [vmem:[#allocation7 + $0xf8] sm:$0xf0]  ;;  %v1978_v42 = vor.u32 %v2729_v33, %v1975_v34  ;;  %v2792_v44 = vld [vmem:[#allocation7 + $0x264] sm:$0xf0] }
  0x48   :  { %852 = vmatpush.bf16.msra.mxu2 %v2062_v6  ;;  %v2285_v45 = vld [vmem:[#allocation7 + $0x2e0] sm:$0xf]  ;;  %v2042_v46 = vor.u32 %v2745_v37, %v2039_v38  ;;  %v2808_v47 = vld [vmem:[#allocation7 + $0x2e4] sm:$0xf0]  ;;  %v2727_v48 = vld [vmem:[#allocation7 + $0x64] sm:$0xf]  ;;  %v2222_v53 = vor.u32 %v2792_v44, %v2221_v43 }
  0x49   :  { %865 = vmatpush.bf16.msra.mxu3 %v2126_v10  ;;  %v1967_v49 = vld [vmem:[#allocation7 + $0x68] sm:$0xf0]  ;;  %v2743_v50 = vld [vmem:[#allocation7 + $0xe4] sm:$0xf]  ;;  %v2213_v54 = vld [vmem:[#allocation7 + $0x250] sm:$0xf]  ;;  %v2286_v57 = vor.u32 %v2808_v47, %v2285_v45 }
  0x4a   :  { %827 = vmatpush.bf16.msra.mxu0 %v1926_v16  ;;  %v2031_v51 = vld [vmem:[#allocation7 + $0xe8] sm:$0xf0]  ;;  %v214_v52 = vld [vmem:[#allocation2] sm:$0xff]  ;;  %v1970_v58 = vor.u32 %v2727_v48, %v1967_v49  ;;  %v2790_v59 = vld [vmem:[#allocation7 + $0x254] sm:$0xf0]  ;;  %s3251_s26 = smov [#allocation20]  }
  0x4b   :  { %840 = vmatpush.bf16.msra.mxu1 %v1990_v19  ;;  %v323_v55 = vunpack.c.l.b16 %v214_v52  ;;  %v324_v56 = vunpack.c.h.b16 %v214_v52  ;;  %v2277_v60 = vld [vmem:[#allocation7 + $0x2d0] sm:$0xf]  ;;  %v2806_v61 = vld [vmem:[#allocation7 + $0x2d4] sm:$0xf0]  ;;  %v2034_v62 = vor.u32 %v2743_v50, %v2031_v51  ;;  %v2725_v63 = vld [vmem:[#allocation7 + $0x54] sm:$0xf]  ;;  %v2214_v8 = vor.u32 %v2790_v59, %v2213_v54 }
  0x4c   :  { %853 = vmatpush.bf16.msra.mxu2 %v2054_v20  ;;  %v1959_v0 = vld [vmem:[#allocation7 + $0x58] sm:$0xf0]  ;;  %v215_v3 = vld [vmem:[#allocation2 + $0x8] sm:$0xff]  ;;  %v2741_v4 = vld [vmem:[#allocation7 + $0xd4] sm:$0xf]  ;;  %v2278_v9 = vor.u32 %v2806_v61, %v2277_v60  ;;  %s1898_s0 = sshll.u32 %s3251_s26, 4  ;;  %s1899_s0 = int_to_ptr.vmem [resolvable:$true] %s1898_s0 }
  0x4d   :  { %866 = vmatpush.bf16.msra.mxu3 %v2118_v24  ;;  %v3386_v1 = vpack.c.b16 %v323_v55, %v323_v55  ;;  %v3388_v2 = vpack.c.b16 %v324_v56, %v324_v56  ;;  %v2023_v5 = vld [vmem:[#allocation7 + $0xd8] sm:$0xf0]  ;;  %v325_v6 = vunpack.c.l.b16 %v215_v3  ;;  %v326_v7 = vunpack.c.h.b16 %v215_v3  ;;  %v2205_v11 = vld [vmem:[#allocation7 + $0x240] sm:$0xf]  ;;  %v2788_v12 = vld [vmem:[#allocation7 + $0x244] sm:$0xf0] }
  0x4e   :  { %828 = vmatpush.bf16.msra.mxu0 %v1918_v31  ;;  %v1962_v10 = vor.u32 %v2725_v63, %v1959_v0  ;;  %v2269_v13 = vld [vmem:[#allocation7 + $0x2c0] sm:$0xf]  ;;  %v2026_v15 = vor.u32 %v2741_v4, %v2023_v5  ;;  %v2804_v16 = vld [vmem:[#allocation7 + $0x2c4] sm:$0xf0]  ;;  %v2723_v17 = vld [vmem:[#allocation7 + $0x44] sm:$0xf]  ;;  %v2206_v22 = vor.u32 %v2788_v12, %v2205_v11 }
  0x4f   :  { %841 = vmatpush.bf16.msra.mxu1 %v1982_v35  ;;  %v3391_v14 = vpack.c.b16 %v325_v6, %v325_v6  ;;  %v1951_v18 = vld [vmem:[#allocation7 + $0x48] sm:$0xf0]  ;;  %v3394_v19 = vpack.c.b16 %v326_v7, %v326_v7  ;;  %v2739_v20 = vld [vmem:[#allocation7 + $0xc4] sm:$0xf]  ;;  %v2270_v23 = vor.u32 %v2804_v16, %v2269_v13  ;;  %v2197_v25 = vld [vmem:[#allocation7 + $0x230] sm:$0xf] }
  0x50   :  { %854 = vmatpush.bf16.msra.mxu2 %v2046_v36  ;;  %v2015_v21 = vld [vmem:[#allocation7 + $0xc8] sm:$0xf0]  ;;  %v1954_v24 = vor.u32 %v2723_v17, %v1951_v18  ;;  %v2786_v26 = vld [vmem:[#allocation7 + $0x234] sm:$0xf0]  ;;  %v2261_v27 = vld [vmem:[#allocation7 + $0x2b0] sm:$0xf] }
  0x51   :  { %867 = vmatpush.bf16.msra.mxu3 %v2110_v39  ;;  %829 = vmatmul.bf16.vlgmr.msra.gmra.mxu0 %v3386_v1  ;;  %v2018_v28 = vor.u32 %v2739_v20, %v2015_v21  ;;  %v2802_v29 = vld [vmem:[#allocation7 + $0x2b4] sm:$0xf0]  ;;  %v2721_v30 = vld [vmem:[#allocation7 + $0x34] sm:$0xf]  ;;  %v1943_v31 = vld [vmem:[#allocation7 + $0x38] sm:$0xf0]  ;;  %v2198_v34 = vor.u32 %v2786_v26, %v2197_v25 }
  0x52   :  { %873 = vmatpush.bf16.msrb.mxu0 %v2230_v40  ;;  %842 = vmatmul.bf16.vlgmr.msra.gmra.mxu1 %v3388_v2  ;;  %v2737_v32 = vld [vmem:[#allocation7 + $0xb4] sm:$0xf]  ;;  %v2007_v33 = vld [vmem:[#allocation7 + $0xb8] sm:$0xf0]  ;;  %v2262_v35 = vor.u32 %v2802_v29, %v2261_v27  ;;  %v1946_v36 = vor.u32 %v2721_v30, %v1943_v31  ;;  %v2189_v37 = vld [vmem:[#allocation7 + $0x220] sm:$0xf] }
  0x53   :  { %886 = vmatpush.bf16.msrb.mxu1 %v2294_v41  ;;  %855 = vmatmul.bf16.vlgmr.msra.gmra.mxu2 %v3391_v14  ;;  %v2784_v38 = vld [vmem:[#allocation7 + $0x224] sm:$0xf0]  ;;  %v2253_v39 = vld [vmem:[#allocation7 + $0x2a0] sm:$0xf]  ;;  %v2010_v40 = vor.u32 %v2737_v32, %v2007_v33  ;;  %v1935_v43 = vld [vmem:[#allocation7 + $0x28] sm:$0xf0] }
  0x54   :  { %899 = vmatpush.bf16.msrb.mxu2 %v1978_v42  ;;  %868 = vmatmul.bf16.vlgmr.msra.gmra.mxu3 %v3394_v19  ;;  %v2800_v41 = vld [vmem:[#allocation7 + $0x2a4] sm:$0xf0]  ;;  %v2719_v42 = vld [vmem:[#allocation7 + $0x24] sm:$0xf]  ;;  %v1999_v45 = vld [vmem:[#allocation7 + $0xa8] sm:$0xf0] }
  0x55   :  { %912 = vmatpush.bf16.msrb.mxu3 %v2042_v46  ;;  %v2735_v44 = vld [vmem:[#allocation7 + $0xa4] sm:$0xf]  ;;  %v2190_v46 = vor.u32 %v2784_v38, %v2189_v37  ;;  %v2254_v47 = vor.u32 %v2800_v41, %v2253_v39  ;;  %v1938_v48 = vor.u32 %v2719_v42, %v1935_v43  ;;  %v2181_v49 = vld [vmem:[#allocation7 + $0x210] sm:$0xf]  ;;  %v2782_v50 = vld [vmem:[#allocation7 + $0x214] sm:$0xf0] }
  0x56   :  { %874 = vmatpush.bf16.msrb.mxu0 %v2222_v53  ;;  %v2245_v51 = vld [vmem:[#allocation7 + $0x290] sm:$0xf]  ;;  %v2002_v52 = vor.u32 %v2735_v44, %v1999_v45  ;;  %v2798_v53 = vld [vmem:[#allocation7 + $0x294] sm:$0xf0]  ;;  %v2717_v54 = vld [vmem:[#allocation7 + $0x14] sm:$0xf] }
  0x57   :  { %887 = vmatpush.bf16.msrb.mxu1 %v2286_v57  ;;  %v1927_v55 = vld [vmem:[#allocation7 + $0x18] sm:$0xf0]  ;;  %v2733_v56 = vld [vmem:[#allocation7 + $0x94] sm:$0xf]  ;;  %v2173_v59 = vld [vmem:[#allocation7 + $0x200] sm:$0xf] }
  0x58   :  { %900 = vmatpush.bf16.msrb.mxu2 %v1970_v58  ;;  %v1991_v57 = vld [vmem:[#allocation7 + $0x98] sm:$0xf0]  ;;  %v2182_v58 = vor.u32 %v2782_v50, %v2181_v49  ;;  %v2780_v60 = vld [vmem:[#allocation7 + $0x204] sm:$0xf0]  ;;  %v2237_v61 = vld [vmem:[#allocation7 + $0x280] sm:$0xf]  ;;  %v1930_v63 = vor.u32 %v2717_v54, %v1927_v55 }
  0x59   :  { %913 = vmatpush.bf16.msrb.mxu3 %v2034_v62  ;;  %v2246_v62 = vor.u32 %v2798_v53, %v2245_v51  ;;  %v2796_v0 = vld [vmem:[#allocation7 + $0x284] sm:$0xf0]  ;;  %v2715_v3 = vld [vmem:[#allocation7 + $0x4] sm:$0xf]  ;;  %v216_v4 = vld [vmem:[#allocation2 + $0x10] sm:$0xff]  ;;  %v1994_v5 = vor.u32 %v2733_v56, %v1991_v57  ;;  %v2174_v12 = vor.u32 %v2780_v60, %v2173_v59  ;;  %s1900_s24 = sshll.u32 %s3446_s15, 4  ;;  %s1901_s24 = int_to_ptr.hbm [resolvable:$true] %s1900_s24 }
  0x5a   :  { %875 = vmatpush.bf16.msrb.mxu0 %v2214_v8  ;;  %v1919_v6 = vld [vmem:[#allocation7 + $0x8] sm:$0xf0]  ;;  %v2731_v7 = vld [vmem:[#allocation7 + $0x84] sm:$0xf]  ;;  %v2777_v11 = vld [vmem:[#allocation7 + $0x1f4] sm:$0xf]  ;;  %v327_v17 = vunpack.c.l.b16 %v216_v4  ;;  %v2238_v18 = vor.u32 %v2796_v0, %v2237_v61 }
  0x5b   :  { %888 = vmatpush.bf16.msrb.mxu1 %v2278_v9  ;;  %v1983_v8 = vld [vmem:[#allocation7 + $0x88] sm:$0xf0]  ;;  %v2761_v9 = vld [vmem:[#allocation7 + $0x174] sm:$0xf]  ;;  %v2167_v13 = vld [vmem:[#allocation7 + $0x1f8] sm:$0xf0]  ;;  %v1922_v20 = vor.u32 %v2715_v3, %v1919_v6 }
  0x5c   :  { %901 = vmatpush.bf16.msrb.mxu2 %v1962_v10  ;;  %v2103_v10 = vld [vmem:[#allocation7 + $0x178] sm:$0xf0]  ;;  %v2809_v21 = vld [vmem:[#allocation7 + $0x2f4] sm:$0xf]  ;;  %v2170_v26 = vor.u32 %v2777_v11, %v2167_v13  ;;  %v2095_v29 = vld [vmem:[#allocation7 + $0x168] sm:$0xf0]  ;;  %v3398_v32 = vpack.c.b16 %v327_v17, %v327_v17 }
  0x5d   :  { %914 = vmatpush.bf16.msrb.mxu3 %v2026_v15  ;;  %v2793_v15 = vld [vmem:[#allocation7 + $0x274] sm:$0xf]  ;;  %v2231_v16 = vld [vmem:[#allocation7 + $0x278] sm:$0xf0]  ;;  %v2106_v25 = vor.u32 %v2761_v9, %v2103_v10  ;;  %v2775_v30 = vld [vmem:[#allocation7 + $0x1e4] sm:$0xf] }
  0x5e   :  { %876 = vmatpush.bf16.msrb.mxu0 %v2206_v22  ;;  %v2295_v22 = vld [vmem:[#allocation7 + $0x2f8] sm:$0xf0]  ;;  %v2234_v27 = vor.u32 %v2793_v15, %v2231_v16  ;;  %v2159_v33 = vld [vmem:[#allocation7 + $0x1e8] sm:$0xf0]  ;;  %v2807_v37 = vld [vmem:[#allocation7 + $0x2e4] sm:$0xf] }
  0x5f   :  { %889 = vmatpush.bf16.msrb.mxu1 %v2270_v23  ;;  %v328_v23 = vunpack.c.h.b16 %v216_v4  ;;  %v2298_v31 = vor.u32 %v2809_v21, %v2295_v22  ;;  %v2287_v38 = vld [vmem:[#allocation7 + $0x2e8] sm:$0xf0]  ;;  %v2162_v41 = vor.u32 %v2775_v30, %v2159_v33  ;;  %v2087_v43 = vld [vmem:[#allocation7 + $0x158] sm:$0xf0]  ;;  %v2773_v44 = vld [vmem:[#allocation7 + $0x1d4] sm:$0xf] }
  0x60   :  { %902 = vmatpush.bf16.msrb.mxu2 %v1954_v24  ;;  %v1986_v24 = vor.u32 %v2731_v7, %v1983_v8  ;;  %v2151_v45 = vld [vmem:[#allocation7 + $0x1d8] sm:$0xf0]  ;;  %v2805_v49 = vld [vmem:[#allocation7 + $0x2d4] sm:$0xf]  ;;  %v2755_v54 = vld [vmem:[#allocation7 + $0x144] sm:$0xf] }
  0x61   :  { %915 = vmatpush.bf16.msrb.mxu3 %v2018_v28  ;;  %v2759_v28 = vld [vmem:[#allocation7 + $0x164] sm:$0xf]  ;;  %v2279_v50 = vld [vmem:[#allocation7 + $0x2d8] sm:$0xf0]  ;;  %v2079_v55 = vld [vmem:[#allocation7 + $0x148] sm:$0xf0] }
  0x62   :  { %877 = vmatpush.bf16.msrb.mxu0 %v2198_v34  ;;  %v2791_v34 = vld [vmem:[#allocation7 + $0x264] sm:$0xf]  ;;  %v2098_v39 = vor.u32 %v2759_v28, %v2095_v29  ;;  %v2282_v57 = vor.u32 %v2805_v49, %v2279_v50  ;;  %v2207_v60 = vld [vmem:[#allocation7 + $0x248] sm:$0xf0]  ;;  %v2753_v0 = vld [vmem:[#allocation7 + $0x134] sm:$0xf] }
  0x63   :  { %890 = vmatpush.bf16.msrb.mxu1 %v2262_v35  ;;  %v2223_v35 = vld [vmem:[#allocation7 + $0x268] sm:$0xf0]  ;;  %v2771_v56 = vld [vmem:[#allocation7 + $0x1c4] sm:$0xf]  ;;  %v2071_v3 = vld [vmem:[#allocation7 + $0x138] sm:$0xf0] }
  0x64   :  { %903 = vmatpush.bf16.msrb.mxu2 %v1946_v36  ;;  %v3400_v36 = vpack.c.b16 %v328_v23, %v328_v23  ;;  %v2226_v42 = vor.u32 %v2791_v34, %v2223_v35  ;;  %v2787_v59 = vld [vmem:[#allocation7 + $0x244] sm:$0xf]  ;;  %v2769_v4 = vld [vmem:[#allocation7 + $0x1b4] sm:$0xf]  ;;  %v2135_v6 = vld [vmem:[#allocation7 + $0x1b8] sm:$0xf0]  ;;  %v2074_v11 = vor.u32 %v2753_v0, %v2071_v3 }
  0x65   :  { %916 = vmatpush.bf16.msrb.mxu3 %v2010_v40  ;;  %v2757_v40 = vld [vmem:[#allocation7 + $0x154] sm:$0xf]  ;;  %v2803_v61 = vld [vmem:[#allocation7 + $0x2c4] sm:$0xf]  ;;  %v2199_v8 = vld [vmem:[#allocation7 + $0x238] sm:$0xf0] }
  0x66   :  { %878 = vmatpush.bf16.msrb.mxu0 %v2190_v46  ;;  %v2290_v46 = vor.u32 %v2807_v37, %v2287_v38  ;;  %v2090_v51 = vor.u32 %v2757_v40, %v2087_v43  ;;  %v2785_v7 = vld [vmem:[#allocation7 + $0x234] sm:$0xf]  ;;  %v2263_v10 = vld [vmem:[#allocation7 + $0x2b8] sm:$0xf0]  ;;  %v2751_v15 = vld [vmem:[#allocation7 + $0x124] sm:$0xf] }
  0x67   :  { %891 = vmatpush.bf16.msrb.mxu1 %v2254_v47  ;;  %v2789_v47 = vld [vmem:[#allocation7 + $0x254] sm:$0xf]  ;;  %v2202_v13 = vor.u32 %v2785_v7, %v2199_v8  ;;  %v2063_v16 = vld [vmem:[#allocation7 + $0x128] sm:$0xf0]  ;;  %v2767_v17 = vld [vmem:[#allocation7 + $0x1a4] sm:$0xf] }
  0x68   :  { %904 = vmatpush.bf16.msrb.mxu2 %v1938_v48  ;;  %v2215_v48 = vld [vmem:[#allocation7 + $0x258] sm:$0xf0]  ;;  %v2801_v9 = vld [vmem:[#allocation7 + $0x2b4] sm:$0xf]  ;;  %v2783_v21 = vld [vmem:[#allocation7 + $0x224] sm:$0xf] }
  0x69   :  { %917 = vmatpush.bf16.msrb.mxu3 %v2002_v52  ;;  %v2154_v52 = vor.u32 %v2773_v44, %v2151_v45  ;;  %v2218_v53 = vor.u32 %v2789_v47, %v2215_v48  ;;  %v2191_v22 = vld [vmem:[#allocation7 + $0x228] sm:$0xf0]  ;;  %v2799_v23 = vld [vmem:[#allocation7 + $0x2a4] sm:$0xf]  ;;  %v2749_v28 = vld [vmem:[#allocation7 + $0x114] sm:$0xf] }
  0x6a   :  { %879 = vmatpush.bf16.msrb.mxu0 %v2182_v58  ;;  %v2143_v58 = vld [vmem:[#allocation7 + $0x1c8] sm:$0xf0]  ;;  %v2055_v29 = vld [vmem:[#allocation7 + $0x118] sm:$0xf0]  ;;  %v2765_v30 = vld [vmem:[#allocation7 + $0x194] sm:$0xf] }
  0x6b   :  { %892 = vmatpush.bf16.msrb.mxu1 %v2246_v62  ;;  %v2271_v62 = vld [vmem:[#allocation7 + $0x2c8] sm:$0xf0]  ;;  %v2119_v33 = vld [vmem:[#allocation7 + $0x198] sm:$0xf0]  ;;  %v2781_v34 = vld [vmem:[#allocation7 + $0x214] sm:$0xf] }
  0x6c   :  { %905 = vmatpush.bf16.msrb.mxu2 %v1930_v63  ;;  %v2146_v63 = vor.u32 %v2771_v56, %v2143_v58  ;;  %v2183_v35 = vld [vmem:[#allocation7 + $0x218] sm:$0xf0]  ;;  %v2797_v37 = vld [vmem:[#allocation7 + $0x294] sm:$0xf]  ;;  %v2122_v40 = vor.u32 %v2765_v30, %v2119_v33  ;;  %v2047_v43 = vld [vmem:[#allocation7 + $0x108] sm:$0xf0] }
  0x6d   :  { %918 = vmatpush.bf16.msrb.mxu3 %v1994_v5  ;;  %v2274_v5 = vor.u32 %v2803_v61, %v2271_v62  ;;  %v2247_v38 = vld [vmem:[#allocation7 + $0x298] sm:$0xf0]  ;;  %v2763_v44 = vld [vmem:[#allocation7 + $0x184] sm:$0xf]  ;;  %v2175_v48 = vld [vmem:[#allocation7 + $0x208] sm:$0xf0] }
  0x6e   :  { %880 = vmatpush.bf16.msrb.mxu0 %v2174_v12  ;;  %v2138_v12 = vor.u32 %v2769_v4, %v2135_v6  ;;  %v2250_v45 = vor.u32 %v2797_v37, %v2247_v38  ;;  %v2779_v47 = vld [vmem:[#allocation7 + $0x204] sm:$0xf]  ;;  %v2239_v50 = vld [vmem:[#allocation7 + $0x288] sm:$0xf0]  ;;  %v2817_v56 = vld [vmem:[#allocation8 + $0x30] sm:$0xff] }
  0x6f   :  { %893 = vmatpush.bf16.msrb.mxu1 %v2238_v18  ;;  %v2266_v18 = vor.u32 %v2801_v9, %v2263_v10  ;;  %v2795_v49 = vld [vmem:[#allocation7 + $0x284] sm:$0xf]  ;;  %v2833_v61 = vld [vmem:[#allocation11 + $0x30] sm:$0xff] }
  0x70   :  { %906 = vmatpush.bf16.msrb.mxu2 %v1922_v20  ;;  %v2127_v20 = vld [vmem:[#allocation7 + $0x1a8] sm:$0xf0]  ;;  %v2815_v58 = vld [vmem:[#allocation8 + $0x20] sm:$0xff]  ;;  %v2813_v62 = vld [vmem:[#allocation8 + $0x10] sm:$0xff] }
  0x71   :  { %919 = vmatpush.bf16.msrb.mxu3 %v1986_v24  ;;  %881 = vmatmul.bf16.vlgmr.msrb.gmra.mxu0 %v3398_v32  ;;  %v2255_v24 = vld [vmem:[#allocation7 + $0x2a8] sm:$0xf0]  ;;  %v314_v0 = vld [vmem:[%s3434_s3] sm:$0x3]  ;;  %v2826_v3 = vld [vmem:[#allocation8 + $0x78] sm:$0xff] }
  0x72   :  { %925 = vmatpush.bf16.msra.mxu0 %v2106_v25  ;;  %894 = vmatmul.bf16.vlgmr.msrb.gmra.mxu1 %v3400_v36  ;;  %v2066_v25 = vor.u32 %v2751_v15, %v2063_v16  ;;  %v2829_v4 = vld [vmem:[#allocation11 + $0x10] sm:$0xff]  ;;  %v316_v7 = vperm.slane %v314_v0, 0  ;;  %v2827_v15 = vld [vmem:[#allocation11] sm:$0xff] }
  0x73   :  { %938 = vmatpush.bf16.msra.mxu1 %v2170_v26  ;;  %907 = vmatmul.bf16.vlgmr.msrb.gmra.mxu2 %v3386_v1  ;;  %v2082_v1 = vor.u32 %v2755_v54, %v2079_v55  ;;  %v2130_v26 = vor.u32 %v2767_v17, %v2127_v20  ;;  %v2242_v54 = vor.u32 %v2795_v49, %v2239_v50  ;;  %v2818_v55 = vld [vmem:[#allocation8 + $0x38] sm:$0xff]  ;;  %v2825_v6 = vld [vmem:[#allocation8 + $0x70] sm:$0xff]  ;;  %v2823_v16 = vld [vmem:[#allocation8 + $0x60] sm:$0xff] }
  0x74   :  { %951 = vmatpush.bf16.msra.mxu2 %v2234_v27  ;;  %920 = vmatmul.bf16.vlgmr.msrb.gmra.mxu3 %v3388_v2  ;;  %v2210_v2 = vor.u32 %v2787_v59, %v2207_v60  ;;  %v2194_v27 = vor.u32 %v2783_v21, %v2191_v22  ;;  %v2834_v59 = vld [vmem:[#allocation11 + $0x38] sm:$0xff] }
  0x75   :  { %964 = vmatpush.bf16.msra.mxu3 %v2298_v31  ;;  %v2258_v31 = vor.u32 %v2799_v23, %v2255_v24  ;;  %v2814_v60 = vld [vmem:[#allocation8 + $0x18] sm:$0xff] }
  0x76   :  { %926 = vmatpush.bf16.msra.mxu0 %v2098_v39  ;;  %v2058_v39 = vor.u32 %v2749_v28, %v2055_v29  ;;  %v217_v21 = vld [vmem:[#allocation5] sm:$0xf] }
  0x77   :  { %939 = vmatpush.bf16.msra.mxu1 %v2162_v41  ;;  %v2186_v41 = vor.u32 %v2781_v34, %v2183_v35  ;;  %v2822_v24 = vld [vmem:[#allocation8 + $0x58] sm:$0xff] }
  0x78   :  { %952 = vmatpush.bf16.msra.mxu2 %v2226_v42  ;;  %v2747_v42 = vld [vmem:[#allocation7 + $0x104] sm:$0xf] }
  0x79   :  { %965 = vmatpush.bf16.msra.mxu3 %v2290_v46  ;;  %v2111_v46 = vld [vmem:[#allocation7 + $0x188] sm:$0xf0] }
  0x7a   :  { %927 = vmatpush.bf16.msra.mxu0 %v2090_v51  ;;  %v2050_v51 = vor.u32 %v2747_v42, %v2047_v43  ;;  %v2865_v42 = vld [vmem:[#allocation16 + $0x74] sm:$0xf] }
  0x7b   :  { %940 = vmatpush.bf16.msra.mxu1 %v2154_v52  ;;  %v2114_v52 = vor.u32 %v2763_v44, %v2111_v46  ;;  %v2455_v44 = vld [vmem:[#allocation16 + $0x78] sm:$0xf0] }
  0x7c   :  { %953 = vmatpush.bf16.msra.mxu2 %v2218_v53  ;;  %v2178_v53 = vor.u32 %v2779_v47, %v2175_v48  ;;  %v2458_v46 = vor.u32 %v2865_v42, %v2455_v44  ;;  %v317_v48 = vperm.slane %v314_v0, 1  ;;  %v2437_v0 = vld [vmem:[#allocation16 + $0x50] sm:$0xf]  ;;  %v2845_v44 = vld [vmem:[#allocation14 + $0x54] sm:$0xf] }
  0x7d   :  { %966 = vmatpush.bf16.msra.mxu3 %v2282_v57  ;;  %v2816_v57 = vld [vmem:[#allocation8 + $0x28] sm:$0xff] }
  0x7e   :  { %928 = vmatpush.bf16.msra.mxu0 %v2082_v1  ;;  %v2812_v1 = vld [vmem:[#allocation8 + $0x8] sm:$0xff] }
  0x7f   :  { %941 = vmatpush.bf16.msra.mxu1 %v2146_v63  ;;  %v2811_v63 = vld [vmem:[#allocation8] sm:$0xff] }
  0x80   :  { %954 = vmatpush.bf16.msra.mxu2 %v2210_v2  ;;  %v2830_v2 = vld [vmem:[#allocation11 + $0x18] sm:$0xff] }
  0x81   :  { %967 = vmatpush.bf16.msra.mxu3 %v2274_v5 }
  0x82   :  { %929 = vmatpush.bf16.msra.mxu0 %v2074_v11  ;;  %v2828_v11 = vld [vmem:[#allocation11 + $0x8] sm:$0xff] }
  0x83   :  { %942 = vmatpush.bf16.msra.mxu1 %v2138_v12  ;;  %v2824_v12 = vld [vmem:[#allocation8 + $0x68] sm:$0xff] }
  0x84   :  { %955 = vmatpush.bf16.msra.mxu2 %v2202_v13 }
  0x85   :  { %968 = vmatpush.bf16.msra.mxu3 %v2266_v18 }
  0x86   :  { %930 = vmatpush.bf16.msra.mxu0 %v2066_v25 }
  0x87   :  { %943 = vmatpush.bf16.msra.mxu1 %v2130_v26  ;;  %v2821_v26 = vld [vmem:[#allocation8 + $0x50] sm:$0xff] }
  0x88   :  { %956 = vmatpush.bf16.msra.mxu2 %v2194_v27 }
  0x89   :  { %969 = vmatpush.bf16.msra.mxu3 %v2258_v31  ;;  %v2820_v31 = vld [vmem:[#allocation8 + $0x48] sm:$0xff] }
  0x8a   :  { %931 = vmatpush.bf16.msra.mxu0 %v2058_v39  ;;  %v2819_v39 = vld [vmem:[#allocation8 + $0x40] sm:$0xff] }
  0x8b   :  { %944 = vmatpush.bf16.msra.mxu1 %v2122_v40  ;;  %v2453_v40 = vld [vmem:[#allocation16 + $0x70] sm:$0xf] }
  0x8c   :  { %957 = vmatpush.bf16.msra.mxu2 %v2186_v41  ;;  %v2866_v41 = vld [vmem:[#allocation16 + $0x74] sm:$0xf0] }
  0x8d   :  { %970 = vmatpush.bf16.msra.mxu3 %v2250_v45  ;;  %v2454_v43 = vor.u32 %v2866_v41, %v2453_v40  ;;  %v2415_v40 = vld [vmem:[#allocation16 + $0x28] sm:$0xf0]  ;;  %v2501_v41 = vld [vmem:[#allocation14 + $0x50] sm:$0xf] }
  0x8e   :  { %932 = vmatpush.bf16.msra.mxu0 %v2050_v51 }
  0x8f   :  { %945 = vmatpush.bf16.msra.mxu1 %v2114_v52 }
  0x90   :  { %958 = vmatpush.bf16.msra.mxu2 %v2178_v53 }
  0x91   :  { %971 = vmatpush.bf16.msra.mxu3 %v2242_v54  ;;  %933 = vmatmul.bf16.vlgmr.msra.gmra.mxu0 %v3391_v14  ;;  %v2832_v14 = vld [vmem:[#allocation11 + $0x28] sm:$0xff] }
  0x92   :  { %1113 = vmatpush.bf16.msrb.mxu0 %v2818_v55  ;;  %946 = vmatmul.bf16.vlgmr.msra.gmra.mxu1 %v3394_v19 }
  0x93   :  { %959 = vmatmul.bf16.vlgmr.msra.gmra.mxu2 %v3398_v32  ;;  %v2831_v32 = vld [vmem:[#allocation11 + $0x20] sm:$0xff]  ;;  %1126 = vmatpush.bf16.msrb.mxu1 %v2826_v3  ;;  %v2862_v3 = vld [vmem:[#allocation16 + $0x54] sm:$0xf0] }
  0x94   :  { %972 = vmatmul.bf16.vlgmr.msra.gmra.mxu3 %v3400_v36  ;;  %1209 = vmatpush.bf16.msrb.mxu2 %v2834_v59 }
  0x95   :  { %1336 = vmatpush.bf16.msrb.mxu3 %v2454_v43  ;;  %v2846_v43 = vld [vmem:[#allocation14 + $0x54] sm:$0xf0] }
  0x96   :  { %1114 = vmatpush.bf16.msrb.mxu0 %v2817_v56 }
  0x97   :  { %1127 = vmatpush.bf16.msrb.mxu1 %v2825_v6  ;;  %v2439_v6 = vld [vmem:[#allocation16 + $0x58] sm:$0xf0] }
  0x98   :  { %1210 = vmatpush.bf16.msrb.mxu2 %v2833_v61 }
  0x9a   :  { %1115 = vmatpush.bf16.msrb.mxu0 %v2816_v57 }
  0x9b   :  { %1128 = vmatpush.bf16.msrb.mxu1 %v2824_v12 }
  0x9c   :  { %1211 = vmatpush.bf16.msrb.mxu2 %v2832_v14 }
  0x9e   :  { %1116 = vmatpush.bf16.msrb.mxu0 %v2815_v58 }
  0x9f   :  { %1129 = vmatpush.bf16.msrb.mxu1 %v2823_v16  ;;  %v2850_v16 = vld [vmem:[#allocation14 + $0x74] sm:$0xf0] }
  0xa0   :  { %1212 = vmatpush.bf16.msrb.mxu2 %v2831_v32  ;;  %v2864_v32 = vld [vmem:[#allocation16 + $0x64] sm:$0xf0] }
  0xa2   :  { %1117 = vmatpush.bf16.msrb.mxu0 %v2814_v60 }
  0xa3   :  { %1130 = vmatpush.bf16.msrb.mxu1 %v2822_v24  ;;  %v2858_v24 = vld [vmem:[#allocation16 + $0x34] sm:$0xf0] }
  0xa4   :  { %1213 = vmatpush.bf16.msrb.mxu2 %v2830_v2  ;;  %v2447_v2 = vld [vmem:[#allocation16 + $0x68] sm:$0xf0] }
  0xa6   :  { %1118 = vmatpush.bf16.msrb.mxu0 %v2813_v62 }
  0xa7   :  { %1131 = vmatpush.bf16.msrb.mxu1 %v2821_v26  ;;  %v2423_v26 = vld [vmem:[#allocation16 + $0x38] sm:$0xf0] }
  0xa8   :  { %1214 = vmatpush.bf16.msrb.mxu2 %v2829_v4 }
  0xaa   :  { %1119 = vmatpush.bf16.msrb.mxu0 %v2812_v1 }
  0xab   :  { %1132 = vmatpush.bf16.msrb.mxu1 %v2820_v31  ;;  %v2847_v31 = vld [vmem:[#allocation14 + $0x64] sm:$0xf] }
  0xac   :  { %1215 = vmatpush.bf16.msrb.mxu2 %v2828_v11  ;;  %v2859_v11 = vld [vmem:[#allocation16 + $0x44] sm:$0xf] }
  0xae   :  { %1120 = vmatpush.bf16.msrb.mxu0 %v2811_v63 }
  0xaf   :  { %1133 = vmatpush.bf16.msrb.mxu1 %v2819_v39  ;;  %v2855_v39 = vld [vmem:[#allocation16 + $0x24] sm:$0xf] }
  0xb0   :  { %1216 = vmatpush.bf16.msrb.mxu2 %v2827_v15  ;;  %v2517_v15 = vld [vmem:[#allocation14 + $0x70] sm:$0xf] }
  0xb2   :  { %1349 = vmatpush.bf16.msra.mxu0 %v2458_v46  ;;  %v2418_v46 = vor.u32 %v2855_v39, %v2415_v40  ;;  %v2583_v39 = vld [vmem:[#allocation17 + $0x78] sm:$0xf0]  ;;  %v2573_v40 = vld [vmem:[#allocation17 + $0x60] sm:$0xf] }
  0xb3   :  { %1217 = vmatmul.bf16.vlgmr.msrb.gmra.mxu2 %v217_v21  ;;  %v2519_v21 = vld [vmem:[#allocation14 + $0x78] sm:$0xf0] }
  0xce   :  { %v830_v36 = vpop.f32.mrf.mxu0 }
  0xcf   :  { %v843_v19 = vpop.f32.mrf.mxu1  ;;  %v831_v13 = vadd.f32 %v830_v36, %v316_v7  ;;  %v2863_v36 = vld [vmem:[#allocation16 + $0x64] sm:$0xf]  ;;  %v2438_v7 = vor.u32 %v2862_v3, %v2437_v0 }
  0xd0   :  { %v2450_v4 = vor.u32 %v2863_v36, %v2447_v2  ;;  %v2842_v36 = vld [vmem:[#allocation14 + $0x34] sm:$0xf0]  ;;  %v2487_v2 = vld [vmem:[#allocation14 + $0x38] sm:$0xf0] }
  0xd1   :  { %v844_v17 = vadd.f32 %v843_v19, %v831_v13  ;;  %v2445_v19 = vld [vmem:[#allocation16 + $0x60] sm:$0xf]  ;;  %v2431_v13 = vld [vmem:[#allocation16 + $0x48] sm:$0xf0] }
  0xd2   :  { %v2446_v63 = vor.u32 %v2864_v32, %v2445_v19  ;;  %1350 = vmatpush.bf16.msra.mxu0 %v2450_v4  ;;  %v2399_v19 = vld [vmem:[#allocation16 + $0x8] sm:$0xf0]  ;;  %v2485_v32 = vld [vmem:[#allocation14 + $0x30] sm:$0xf] }
  0xd4   :  { %1337 = vmatpush.bf16.msrb.mxu3 %v2446_v63  ;;  %v2841_v63 = vld [vmem:[#allocation14 + $0x34] sm:$0xf] }
  0xd6   :  { %v856_v8 = vpop.f32.mrf.mxu2  ;;  %v832_v9 = vpop.f32.mrf.mxu0 }
  0xd7   :  { %v845_v5 = vpop.f32.mrf.mxu1  ;;  %v869_v10 = vpop.f32.mrf.mxu3  ;;  %v857_v22 = vadd.f32 %v856_v8, %v844_v17  ;;  %v2429_v9 = vld [vmem:[#allocation16 + $0x40] sm:$0xf]  ;;  %v2434_v17 = vor.u32 %v2859_v11, %v2431_v13  ;;  %v2839_v11 = vld [vmem:[#allocation14 + $0x24] sm:$0xf] }
  0xd8   :  { %v2861_v5 = vld [vmem:[#allocation16 + $0x54] sm:$0xf]  ;;  %1338 = vmatpush.bf16.msrb.mxu3 %v2438_v7  ;;  %v2490_v7 = vor.u32 %v2841_v63, %v2487_v2  ;;  %v2895_v2 = vld [vmem:[#allocation17 + $0xe4] sm:$0xf] }
  0xd9   :  { %v870_v23 = vadd.f32 %v869_v10, %v857_v22  ;;  %v2442_v8 = vor.u32 %v2861_v5, %v2439_v6  ;;  %v2860_v10 = vld [vmem:[#allocation16 + $0x44] sm:$0xf0]  ;;  %v2421_v22 = vld [vmem:[#allocation16 + $0x30] sm:$0xf]  ;;  %v2486_v6 = vor.u32 %v2842_v36, %v2485_v32 }
  0xda   :  { %v2430_v12 = vor.u32 %v2860_v10, %v2429_v9  ;;  %v2840_v9 = vld [vmem:[#allocation14 + $0x24] sm:$0xf0] }
  0xdb   :  { %1351 = vmatpush.bf16.msra.mxu0 %v2442_v8  ;;  %v2477_v8 = vld [vmem:[#allocation14 + $0x20] sm:$0xf]  ;;  %v2896_v32 = vld [vmem:[#allocation17 + $0xe4] sm:$0xf0] }
  0xdc   :  { %1339 = vmatpush.bf16.msrb.mxu3 %v2430_v12  ;;  %v2479_v12 = vld [vmem:[#allocation14 + $0x28] sm:$0xf0] }
  0xde   :  { %v858_v18 = vpop.f32.mrf.mxu2 }
  0xdf   :  { %v871_v20 = vpop.f32.mrf.mxu3  ;;  %v2518_v18 = vor.u32 %v2850_v16, %v2517_v15  ;;  %1352 = vmatpush.bf16.msra.mxu0 %v2434_v17  ;;  %v2478_v15 = vor.u32 %v2840_v9, %v2477_v8  ;;  %v2482_v16 = vor.u32 %v2839_v11, %v2479_v12  ;;  %v2894_v11 = vld [vmem:[#allocation17 + $0xd4] sm:$0xf0]  ;;  %v2893_v12 = vld [vmem:[#allocation17 + $0xd4] sm:$0xf] }
  0xe0   :  { %v2849_v20 = vld [vmem:[#allocation14 + $0x74] sm:$0xf] }
  0xe1   :  { %1442 = vmatpush.bf16.msra.mxu1 %v2518_v18 }
  0xee   :  { %v882_v25 = vpop.f32.mrf.mxu0 }
  0xef   :  { %v883_v27 = vadd.f32 %v882_v25, %v870_v23  ;;  %v895_v28 = vpop.f32.mrf.mxu1  ;;  %v2522_v23 = vor.u32 %v2849_v20, %v2519_v21  ;;  %v2857_v25 = vld [vmem:[#allocation16 + $0x34] sm:$0xf]  ;;  %v2469_v20 = vld [vmem:[#allocation14 + $0x10] sm:$0xf]  ;;  %v2838_v21 = vld [vmem:[#allocation14 + $0x14] sm:$0xf0] }
  0xf1   :  { %v896_v29 = vadd.f32 %v895_v28, %v883_v27  ;;  %v2422_v27 = vor.u32 %v2858_v24, %v2421_v22  ;;  %v2426_v28 = vor.u32 %v2857_v25, %v2423_v26  ;;  %1455 = vmatpush.bf16.msra.mxu2 %v2522_v23  ;;  %v2837_v22 = vld [vmem:[#allocation14 + $0x14] sm:$0xf]  ;;  %v2470_v23 = vor.u32 %v2838_v21, %v2469_v20  ;;  %v2471_v24 = vld [vmem:[#allocation14 + $0x18] sm:$0xf0]  ;;  %v2461_v26 = vld [vmem:[#allocation14] sm:$0xf] }
  0xf2   :  { %v2474_v25 = vor.u32 %v2837_v22, %v2471_v24  ;;  %v2873_v20 = vld [vmem:[#allocation17 + $0x34] sm:$0xf]  ;;  %v2551_v22 = vld [vmem:[#allocation17 + $0x38] sm:$0xf0]  ;;  %v2892_v24 = vld [vmem:[#allocation17 + $0xc4] sm:$0xf0] }
  0xf3   :  { %v977_v30 = vmax.f32 %v896_v29, 0.0  ;;  %v2509_v29 = vld [vmem:[#allocation14 + $0x60] sm:$0xf]  ;;  %1340 = vmatpush.bf16.msrb.mxu3 %v2422_v27  ;;  %1353 = vmatpush.bf16.msra.mxu0 %v2426_v28  ;;  %v2836_v27 = vld [vmem:[#allocation14 + $0x4] sm:$0xf0] }
  0xf4   :  { %v2835_v28 = vld [vmem:[#allocation14 + $0x4] sm:$0xf] }
  0xf5   :  { %v979_v33 = vpack.c.bf16 %v977_v30, %v977_v30  ;;  %v2848_v30 = vld [vmem:[#allocation14 + $0x64] sm:$0xf0] }
  0xf6   :  { %v908_v34 = vpop.f32.mrf.mxu2  ;;  %v884_v37 = vpop.f32.mrf.mxu0 }
  0xf7   :  { %v921_v35 = vpop.f32.mrf.mxu3  ;;  %1121 = vmatmul.bf16.vlgmr.msrb.gmra.mxu0 %v979_v33  ;;  %v897_v38 = vpop.f32.mrf.mxu1  ;;  %v909_v49 = vadd.f32 %v908_v34, %v317_v48  ;;  %v2510_v33 = vor.u32 %v2848_v30, %v2509_v29  ;;  %v2511_v34 = vld [vmem:[#allocation14 + $0x68] sm:$0xf0]  ;;  %v2856_v37 = vld [vmem:[#allocation16 + $0x24] sm:$0xf0]  ;;  %v2405_v48 = vld [vmem:[#allocation16 + $0x10] sm:$0xf]  ;;  %v2462_v29 = vor.u32 %v2836_v27, %v2461_v26 }
  0xf8   :  { %v2514_v38 = vor.u32 %v2847_v31, %v2511_v34  ;;  %1354 = vmatpush.bf16.msra.mxu0 %v2418_v46  ;;  %v2463_v30 = vld [vmem:[#allocation14 + $0x8] sm:$0xf0]  ;;  %v2581_v34 = vld [vmem:[#allocation17 + $0x70] sm:$0xf]  ;;  %v2891_v27 = vld [vmem:[#allocation17 + $0xc4] sm:$0xf] }
  0xf9   :  { %v922_v50 = vadd.f32 %v921_v35, %v909_v49  ;;  %v2413_v35 = vld [vmem:[#allocation16 + $0x20] sm:$0xf]  ;;  %1443 = vmatpush.bf16.msra.mxu1 %v2510_v33  ;;  %v2854_v49 = vld [vmem:[#allocation16 + $0x14] sm:$0xf0]  ;;  %v2466_v33 = vor.u32 %v2835_v28, %v2463_v30  ;;  %v2623_v28 = vld [vmem:[#allocation17 + $0xc8] sm:$0xf0] }
  0xfa   :  { %v2414_v42 = vor.u32 %v2856_v37, %v2413_v35  ;;  %1456 = vmatpush.bf16.msra.mxu2 %v2514_v38  ;;  %v2882_v35 = vld [vmem:[#allocation17 + $0x74] sm:$0xf0]  ;;  %v2881_v37 = vld [vmem:[#allocation17 + $0x74] sm:$0xf]  ;;  %v2626_v30 = vor.u32 %v2891_v27, %v2623_v28 }
  0xfb   :  { %v2582_v38 = vor.u32 %v2882_v35, %v2581_v34  ;;  %v2543_v34 = vld [vmem:[#allocation17 + $0x28] sm:$0xf0] }
  0xfc   :  { %1341 = vmatpush.bf16.msrb.mxu3 %v2414_v42  ;;  %v2586_v42 = vor.u32 %v2881_v37, %v2583_v39 }
  0xfe   :  { %v910_v45 = vpop.f32.mrf.mxu2 }
  0xff   :  { %v923_v47 = vpop.f32.mrf.mxu3  ;;  %v2503_v45 = vld [vmem:[#allocation14 + $0x58] sm:$0xf0] }
 0x100   :  { %v2502_v47 = vor.u32 %v2846_v43, %v2501_v41  ;;  %v2880_v41 = vld [vmem:[#allocation17 + $0x64] sm:$0xf0]  ;;  %v2879_v43 = vld [vmem:[#allocation17 + $0x64] sm:$0xf] }
 0x101   :  { %v2574_v46 = vor.u32 %v2880_v41, %v2573_v40  ;;  %v2613_v41 = vld [vmem:[#allocation17 + $0xb0] sm:$0xf] }
 0x102   :  { %1444 = vmatpush.bf16.msra.mxu1 %v2502_v47  ;;  %v2898_v47 = vld [vmem:[#allocation17 + $0xf4] sm:$0xf0] }
 0x10e   :  { %v934_v51 = vpop.f32.mrf.mxu0 }
 0x10f   :  { %v947_v52 = vpop.f32.mrf.mxu1  ;;  %v935_v53 = vadd.f32 %v934_v51, %v922_v50  ;;  %v2506_v50 = vor.u32 %v2845_v44, %v2503_v45  ;;  %v2853_v51 = vld [vmem:[#allocation16 + $0x14] sm:$0xf]  ;;  %v2575_v44 = vld [vmem:[#allocation17 + $0x68] sm:$0xf0]  ;;  %v2645_v45 = vld [vmem:[#allocation17 + $0xf0] sm:$0xf] }
 0x111   :  { %v948_v54 = vadd.f32 %v947_v52, %v935_v53  ;;  %v2407_v52 = vld [vmem:[#allocation16 + $0x18] sm:$0xf0]  ;;  %v2493_v53 = vld [vmem:[#allocation14 + $0x40] sm:$0xf]  ;;  %1457 = vmatpush.bf16.msra.mxu2 %v2506_v50  ;;  %v2578_v50 = vor.u32 %v2879_v43, %v2575_v44  ;;  %v2889_v43 = vld [vmem:[#allocation17 + $0xb4] sm:$0xf] }
 0x116   :  { %v960_v55 = vpop.f32.mrf.mxu2  ;;  %v936_v58 = vpop.f32.mrf.mxu0 }
 0x117   :  { %v961_v56 = vadd.f32 %v960_v55, %v948_v54  ;;  %v973_v57 = vpop.f32.mrf.mxu3  ;;  %v949_v59 = vpop.f32.mrf.mxu1  ;;  %v2844_v54 = vld [vmem:[#allocation14 + $0x44] sm:$0xf0]  ;;  %v2843_v55 = vld [vmem:[#allocation14 + $0x44] sm:$0xf]  ;;  %v2406_v58 = vor.u32 %v2854_v49, %v2405_v48  ;;  %v2897_v48 = vld [vmem:[#allocation17 + $0xf4] sm:$0xf] }
 0x118   :  { %v2410_v59 = vor.u32 %v2853_v51, %v2407_v52  ;;  %v2647_v49 = vld [vmem:[#allocation17 + $0xf8] sm:$0xf0]  ;;  %v2646_v51 = vor.u32 %v2898_v47, %v2645_v45  ;;  %v2533_v47 = vld [vmem:[#allocation17 + $0x10] sm:$0xf] }
 0x119   :  { %v974_v60 = vadd.f32 %v973_v57, %v961_v56  ;;  %v2495_v56 = vld [vmem:[#allocation14 + $0x48] sm:$0xf0]  ;;  %v2932_v57 = vld [vmem:[#allocation13] ss:$0 sm:$0xff]  ;;  %1342 = vmatpush.bf16.msrb.mxu3 %v2406_v58  ;;  %v2650_v52 = vor.u32 %v2897_v48, %v2647_v49  ;;  %v2870_v48 = vld [vmem:[#allocation17 + $0x14] sm:$0xf0] }
 0x11a   :  { %1355 = vmatpush.bf16.msra.mxu0 %v2410_v59  ;;  %v2615_v45 = vld [vmem:[#allocation17 + $0xb8] sm:$0xf0]  ;;  %v2869_v49 = vld [vmem:[#allocation17 + $0x14] sm:$0xf] }
 0x11b   :  { %v978_v61 = vmax.f32 %v974_v60, 0.0  ;;  %v2494_v60 = vor.u32 %v2844_v54, %v2493_v53  ;;  %v2931_v53 = vld [vmem:[#allocation10] ss:$0 sm:$0xff] }
 0x11d   :  { %v980_v62 = vpack.c.bf16 %v978_v61, %v978_v61  ;;  %v2397_v61 = vld [vmem:[#allocation16] sm:$0xf]  ;;  %1445 = vmatpush.bf16.msra.mxu1 %v2494_v60  ;;  %v2565_v60 = vld [vmem:[#allocation17 + $0x50] sm:$0xf] }
 0x11e   :  { %v962_v14 = vpop.f32.mrf.mxu2 }
 0x11f   :  { %v975_v1 = vpop.f32.mrf.mxu3  ;;  %1134 = vmatmul.bf16.vlgmr.msrb.gmra.mxu1 %v980_v62  ;;  %v2852_v62 = vld [vmem:[#allocation16 + $0x4] sm:$0xf0]  ;;  %v2851_v14 = vld [vmem:[#allocation16 + $0x4] sm:$0xf] }
 0x120   :  { %v2498_v1 = vor.u32 %v2843_v55, %v2495_v56  ;;  %v2398_v3 = vor.u32 %v2852_v62, %v2397_v61  ;;  %v2402_v5 = vor.u32 %v2851_v14, %v2399_v19  ;;  %v2878_v61 = vld [vmem:[#allocation17 + $0x54] sm:$0xf0]  ;;  %v2877_v62 = vld [vmem:[#allocation17 + $0x54] sm:$0xf]  ;;  %v2637_v19 = vld [vmem:[#allocation17 + $0xe0] sm:$0xf] }
 0x121   :  { %1446 = vmatpush.bf16.msra.mxu1 %v2486_v6  ;;  %v2566_v14 = vor.u32 %v2878_v61, %v2565_v60  ;;  %v2638_v63 = vor.u32 %v2896_v32, %v2637_v19  ;;  %v2875_v6 = vld [vmem:[#allocation17 + $0x44] sm:$0xf]  ;;  %v2525_v60 = vld [vmem:[#allocation17] sm:$0xf]  ;;  %v2868_v61 = vld [vmem:[#allocation17 + $0x4] sm:$0xf0] }
 0x122   :  { %1458 = vmatpush.bf16.msra.mxu2 %v2498_v1  ;;  %1343 = vmatpush.bf16.msrb.mxu3 %v2398_v3  ;;  %v2567_v1 = vld [vmem:[#allocation17 + $0x58] sm:$0xf0]  ;;  %v2557_v3 = vld [vmem:[#allocation17 + $0x40] sm:$0xf]  ;;  %v2597_v32 = vld [vmem:[#allocation17 + $0x90] sm:$0xf] }
 0x123   :  { %1356 = vmatpush.bf16.msra.mxu0 %v2402_v5  ;;  %v2570_v36 = vor.u32 %v2877_v62, %v2567_v1  ;;  %v2876_v5 = vld [vmem:[#allocation17 + $0x44] sm:$0xf0]  ;;  %v2867_v62 = vld [vmem:[#allocation17 + $0x4] sm:$0xf]  ;;  %v2527_v1 = vld [vmem:[#allocation17 + $0x8] sm:$0xf0] }
 0x124   :  { %v2558_v8 = vor.u32 %v2876_v5, %v2557_v3  ;;  %v2530_v19 = vor.u32 %v2867_v62, %v2527_v1  ;;  %v2884_v5 = vld [vmem:[#allocation17 + $0x84] sm:$0xf0]  ;;  %v2933_v1 = vld [vmem:[%s3445_s14] ss:$0 sm:$0xff] }
 0x125   :  { %1447 = vmatpush.bf16.msra.mxu1 %v2478_v15  ;;  %v2631_v15 = vld [vmem:[#allocation17 + $0xd8] sm:$0xf0] }
 0x126   :  { %1459 = vmatpush.bf16.msra.mxu2 %v2490_v7  ;;  %1678 = vmatpush.bf16.msra.mxu3 %v2582_v38  ;;  %v2559_v7 = vld [vmem:[#allocation17 + $0x48] sm:$0xf0] }
 0x127   :  { %1691 = vmatpush.bf16.msrb.mxu0 %v2646_v51  ;;  %v2562_v9 = vor.u32 %v2875_v6, %v2559_v7  ;;  %v2534_v51 = vor.u32 %v2870_v48, %v2533_v47  ;;  %v2883_v6 = vld [vmem:[#allocation17 + $0x84] sm:$0xf] }
 0x129   :  { %1448 = vmatpush.bf16.msra.mxu1 %v2470_v23  ;;  %v2621_v23 = vld [vmem:[#allocation17 + $0xc0] sm:$0xf] }
 0x12a   :  { %1460 = vmatpush.bf16.msra.mxu2 %v2482_v16  ;;  %1679 = vmatpush.bf16.msra.mxu3 %v2574_v46  ;;  %v2634_v16 = vor.u32 %v2893_v12, %v2631_v15  ;;  %v2622_v26 = vor.u32 %v2892_v24, %v2621_v23  ;;  %v2618_v46 = vor.u32 %v2889_v43, %v2615_v45  ;;  %v2905_v12 = vld [vmem:[#allocation19 + $0x30] sm:$0xff]  ;;  %v2904_v15 = vld [vmem:[#allocation19 + $0x28] sm:$0xff] }
 0x12b   :  { %1692 = vmatpush.bf16.msrb.mxu0 %v2638_v63  ;;  %v2885_v63 = vld [vmem:[#allocation17 + $0x94] sm:$0xf]  ;;  %v2908_v43 = vld [vmem:[#allocation19 + $0x48] sm:$0xff] }
 0x12d   :  { %1449 = vmatpush.bf16.msra.mxu1 %v2462_v29  ;;  %v2541_v29 = vld [vmem:[#allocation17 + $0x20] sm:$0xf] }
 0x12e   :  { %1461 = vmatpush.bf16.msra.mxu2 %v2474_v25  ;;  %1680 = vmatpush.bf16.msra.mxu3 %v2566_v14  ;;  %v2554_v25 = vor.u32 %v2873_v20, %v2551_v22  ;;  %v2526_v14 = vor.u32 %v2868_v61, %v2525_v60 }
 0x131   :  { %1704 = vmatpush.bf16.msrb.mxu1 %v2586_v42  ;;  %v2890_v42 = vld [vmem:[#allocation17 + $0xb4] sm:$0xf0] }
 0x132   :  { %1462 = vmatpush.bf16.msra.mxu2 %v2466_v33  ;;  %1681 = vmatpush.bf16.msra.mxu3 %v2558_v8  ;;  %v2871_v33 = vld [vmem:[#allocation17 + $0x24] sm:$0xf]  ;;  %v2614_v44 = vor.u32 %v2890_v42, %v2613_v41  ;;  %v2591_v8 = vld [vmem:[#allocation17 + $0x88] sm:$0xf0]  ;;  %v2909_v42 = vld [vmem:[#allocation19 + $0x50] sm:$0xff] }
 0x133   :  { %v2546_v37 = vor.u32 %v2871_v33, %v2543_v34  ;;  %v2900_v41 = vld [vmem:[#allocation19 + $0x8] sm:$0xff] }
 0x135   :  { %1705 = vmatpush.bf16.msrb.mxu1 %v2578_v50 }
 0x136   :  { %v1218_v0 = vpop.f32.mrf.mxu2  ;;  %1717 = vmatpush.bf16.msrb.mxu2 %v2650_v52  ;;  %v2535_v52 = vld [vmem:[#allocation17 + $0x18] sm:$0xf0] }
 0x137   :  { %v1219_v4 = vadd.f32 %v2932_v57, %v1218_v0  ;;  %v2639_v0 = vld [vmem:[#allocation17 + $0xe8] sm:$0xf0] }
 0x139   :  { %v1222_v10 = vmax.f32 %v1219_v4, 0.0  ;;  %v2642_v4 = vor.u32 %v2895_v2, %v2639_v0  ;;  %1706 = vmatpush.bf16.msrb.mxu1 %v2570_v36  ;;  %v2886_v36 = vld [vmem:[#allocation17 + $0x94] sm:$0xf0]  ;;  %v2599_v0 = vld [vmem:[#allocation17 + $0x98] sm:$0xf0] }
 0x13a   :  { %v2598_v2 = vor.u32 %v2886_v36, %v2597_v32  ;;  %v2602_v3 = vor.u32 %v2885_v63, %v2599_v0 }
 0x13b   :  { %v1223_v13 = vpack.c.bf16 %v1222_v10, %v1222_v10  ;;  %1718 = vmatpush.bf16.msrb.mxu2 %v2642_v4  ;;  %v2629_v10 = vld [vmem:[#allocation17 + $0xd0] sm:$0xf]  ;;  %v2589_v4 = vld [vmem:[#allocation17 + $0x80] sm:$0xf] }
 0x13c   :  { %v2590_v7 = vor.u32 %v2884_v5, %v2589_v4 }
 0x13d   :  { %1344 = vmatmul.bf16.vlgmr.msrb.gmra.mxu3 %v1223_v13  ;;  %1357 = vmatmul.bf16.vlgmr.msra.gmra.mxu0 %v1223_v13  ;;  %v2630_v13 = vor.u32 %v2894_v11, %v2629_v10  ;;  %v2906_v10 = vld [vmem:[#allocation19 + $0x38] sm:$0xff] }
 0x13e   :  { %v1220_v17 = vpop.f32.mrf.mxu2  ;;  %1707 = vmatpush.bf16.msrb.mxu1 %v2562_v9  ;;  %v2594_v9 = vor.u32 %v2883_v6, %v2591_v8  ;;  %v2914_v11 = vld [vmem:[#allocation19 + $0x78] sm:$0xff] }
 0x13f   :  { %1693 = vmatpush.bf16.msrb.mxu0 %v2630_v13  ;;  %v2549_v17 = vld [vmem:[#allocation17 + $0x30] sm:$0xf]  ;;  %1719 = vmatpush.bf16.msrb.mxu2 %v2634_v16  ;;  %v2912_v16 = vld [vmem:[#allocation19 + $0x68] sm:$0xff] }
 0x140   :  { %v2913_v13 = vld [vmem:[#allocation19 + $0x70] sm:$0xff] }
 0x142   :  { %1708 = vmatpush.bf16.msrb.mxu1 %v2554_v25 }
 0x143   :  { %1694 = vmatpush.bf16.msrb.mxu0 %v2622_v26  ;;  %1720 = vmatpush.bf16.msrb.mxu2 %v2626_v30 }
 0x146   :  { %1709 = vmatpush.bf16.msrb.mxu1 %v2546_v37  ;;  %v2911_v37 = vld [vmem:[#allocation19 + $0x60] sm:$0xff] }
 0x147   :  { %1695 = vmatpush.bf16.msrb.mxu0 %v2614_v44  ;;  %1721 = vmatpush.bf16.msrb.mxu2 %v2618_v46  ;;  %v2907_v44 = vld [vmem:[#allocation19 + $0x40] sm:$0xff] }
 0x148   :  { %v1512_v46 = vld [vmem:[%s3443_s12] sm:$0x3] }
 0x149   :  { %v1514_v47 = vperm.slane %v1512_v46, 0 }
 0x174   :  { %v1122_v18 = vpop.f32.mrf.mxu0 }
 0x175   :  { %v1123_v54 = vadd.f32 %v2931_v53, %v1122_v18  ;;  %v2874_v18 = vld [vmem:[#allocation17 + $0x34] sm:$0xf0]  ;;  %v2538_v53 = vor.u32 %v2869_v49, %v2535_v52 }
 0x176   :  { %v2550_v21 = vor.u32 %v2874_v18, %v2549_v17  ;;  %v2903_v17 = vld [vmem:[#allocation19 + $0x20] sm:$0xff] }
 0x177   :  { %1710 = vmatpush.bf16.msrb.mxu1 %v2538_v53  ;;  %v1468_v18 = vld [vmem:[%s3441_s10] sm:$0x3] }
 0x178   :  { %1682 = vmatpush.bf16.msra.mxu3 %v2550_v21  ;;  %v1470_v20 = vperm.slane %v1468_v18, 0  ;;  %v1471_v25 = vperm.slane %v1468_v18, 1 }
 0x17b   :  { %1711 = vmatpush.bf16.msrb.mxu1 %v2530_v19 }
 0x17c   :  { %v1124_v31 = vpop.f32.mrf.mxu0 }
 0x17d   :  { %v2872_v31 = vld [vmem:[#allocation17 + $0x24] sm:$0xf0] }
 0x17e   :  { %v2542_v35 = vor.u32 %v2872_v31, %v2541_v29 }
 0x180   :  { %1683 = vmatpush.bf16.msra.mxu3 %v2542_v35  ;;  %v2902_v35 = vld [vmem:[#allocation19 + $0x18] sm:$0xff] }
 0x184   :  { %1684 = vmatpush.bf16.msra.mxu3 %v2534_v51 }
 0x188   :  { %1685 = vmatpush.bf16.msra.mxu3 %v2526_v14 }
 0x18c   :  { %1866 = vmatpush.bf16.msrb.mxu3 %v2906_v10 }
 0x190   :  { %1867 = vmatpush.bf16.msrb.mxu3 %v2905_v12 }
 0x194   :  { %1868 = vmatpush.bf16.msrb.mxu3 %v2904_v15 }
 0x198   :  { %1869 = vmatpush.bf16.msrb.mxu3 %v2903_v17 }
 0x19c   :  { %v1135_v55 = vpop.f32.mrf.mxu1  ;;  %1870 = vmatpush.bf16.msrb.mxu3 %v2902_v35 }
 0x19d   :  { %v1136_v56 = vadd.f32 %v1135_v55, %v1123_v54  ;;  %v2605_v54 = vld [vmem:[#allocation17 + $0xa0] sm:$0xf]  ;;  %v2888_v55 = vld [vmem:[#allocation17 + $0xa4] sm:$0xf0] }
 0x19f   :  { %v1139_v57 = vmax.f32 %v1136_v56, 0.0  ;;  %v2606_v56 = vor.u32 %v2888_v55, %v2605_v54 }
 0x1a1   :  { %v1140_v58 = vpack.c.bf16 %v1139_v57, %v1139_v57  ;;  %v2887_v57 = vld [vmem:[#allocation17 + $0xa4] sm:$0xf]  ;;  %1696 = vmatpush.bf16.msrb.mxu0 %v2606_v56 }
 0x1a3   :  { %1450 = vmatmul.bf16.vlgmr.msra.gmra.mxu1 %v1140_v58  ;;  %1463 = vmatmul.bf16.vlgmr.msra.gmra.mxu2 %v1140_v58  ;;  %v2607_v58 = vld [vmem:[#allocation17 + $0xa8] sm:$0xf0] }
 0x1a4   :  { %v1137_v59 = vpop.f32.mrf.mxu1 }
 0x1a5   :  { %v2610_v59 = vor.u32 %v2887_v57, %v2607_v58  ;;  %1697 = vmatpush.bf16.msrb.mxu0 %v2598_v2 }
 0x1a7   :  { %1722 = vmatpush.bf16.msrb.mxu2 %v2610_v59 }
 0x1a9   :  { %1698 = vmatpush.bf16.msrb.mxu0 %v2590_v7 }
 0x1ab   :  { %1723 = vmatpush.bf16.msrb.mxu2 %v2602_v3 }
 0x1ad   :  { %1879 = vmatpush.bf16.msra.mxu0 %v2914_v11 }
 0x1af   :  { %1724 = vmatpush.bf16.msrb.mxu2 %v2594_v9 }
 0x1b1   :  { %1880 = vmatpush.bf16.msra.mxu0 %v2913_v13 }
 0x1b5   :  { %1881 = vmatpush.bf16.msra.mxu0 %v2912_v16 }
 0x1b9   :  { %1882 = vmatpush.bf16.msra.mxu0 %v2911_v37 }
 0x1ba   :  { %v3413_v38 = vpop.f32.mrf.mxu0 }
 0x1c0   :  { %v3415_v39 = vpop.f32.mrf.mxu3 }
 0x1c2   :  { %v1360_v40 = vpop.f32.mrf.mxu0 }
 0x1c3   :  { %v2910_v40 = vld [vmem:[#allocation19 + $0x58] sm:$0xff] }
 0x1c4   :  { %1883 = vmatpush.bf16.msra.mxu0 %v2910_v40 }
 0x1c8   :  { %v1347_v50 = vpop.f32.mrf.mxu3  ;;  %1884 = vmatpush.bf16.msra.mxu0 %v2909_v42 }
 0x1c9   :  { %v1515_v50 = vperm.slane %v1512_v46, 1 }
 0x1cc   :  { %1885 = vmatpush.bf16.msra.mxu0 %v2908_v43 }
 0x1d0   :  { %1886 = vmatpush.bf16.msra.mxu0 %v2907_v44 }
 0x220   :  { %v1451_v21 = vpop.f32.mrf.mxu1 }
 0x221   :  { %v1452_v22 = vadd.f32 %v1451_v21, %v3415_v39  ;;  %v2901_v39 = vld [vmem:[#allocation19 + $0x10] sm:$0xff] }
 0x222   :  { %1871 = vmatpush.bf16.msrb.mxu3 %v2901_v39 }
 0x223   :  { %v1474_v23 = vadd.f32 %v1470_v20, %v1452_v22 }
 0x225   :  { %v1476_v24 = vmax.f32 %v1474_v23, 0.0 }
 0x226   :  { %v1464_v26 = vpop.f32.mrf.mxu2  ;;  %1872 = vmatpush.bf16.msrb.mxu3 %v2900_v41 }
 0x227   :  { %v1478_v27 = vpack.c.bf16 %v1476_v24, %v1476_v24  ;;  %v1465_v28 = vadd.f32 %v1464_v26, %v3413_v38  ;;  %v2899_v38 = vld [vmem:[#allocation19] sm:$0xff] }
 0x228   :  { %v1453_v29 = vpop.f32.mrf.mxu1 }
 0x229   :  { %v1475_v30 = vadd.f32 %v1471_v25, %v1465_v28  ;;  %1686 = vmatmul.bf16.vlgmr.msra.gmra.mxu3 %v1478_v27  ;;  %1712 = vmatmul.bf16.vlgmr.msrb.gmra.mxu1 %v1478_v27 }
 0x22a   :  { %1873 = vmatpush.bf16.msrb.mxu3 %v2899_v38 }
 0x22b   :  { %v1477_v31 = vmax.f32 %v1475_v30, 0.0 }
 0x22d   :  { %v1479_v33 = vpack.c.bf16 %v1477_v31, %v1477_v31 }
 0x22e   :  { %v1466_v34 = vpop.f32.mrf.mxu2 }
 0x22f   :  { %1699 = vmatmul.bf16.vlgmr.msrb.gmra.mxu0 %v1479_v33  ;;  %1725 = vmatmul.bf16.vlgmr.msrb.gmra.mxu2 %v1479_v33 }
 0x2a6   :  { %v1713_v45 = vpop.f32.mrf.mxu1 }
 0x2a7   :  { %v1714_v54 = vadd.f32 %v1713_v45, %v1515_v50 }
 0x2ac   :  { %v1687_v48 = vpop.f32.mrf.mxu3  ;;  %v1700_v49 = vpop.f32.mrf.mxu0 }
 0x2ad   :  { %v1688_v51 = vadd.f32 %v1687_v48, %v1514_v47 }
 0x2ae   :  { %v1715_v52 = vpop.f32.mrf.mxu1 }
 0x2af   :  { %v1701_v53 = vadd.f32 %v1700_v49, %v1688_v51 }
 0x2b1   :  { %v1730_v55 = vmax.f32 %v1701_v53, 0.0 }
 0x2b2   :  { %v1726_v56 = vpop.f32.mrf.mxu2 }
 0x2b3   :  { %v1732_v57 = vpack.c.bf16 %v1730_v55, %v1730_v55  ;;  %v1727_v58 = vadd.f32 %v1726_v56, %v1714_v54 }
 0x2b4   :  { %v1689_v59 = vpop.f32.mrf.mxu3  ;;  %v1702_v60 = vpop.f32.mrf.mxu0 }
 0x2b5   :  { %v1731_v61 = vmax.f32 %v1727_v58, 0.0  ;;  %1874 = vmatmul.bf16.vlgmr.msrb.gmra.mxu3 %v1732_v57 }
 0x2b7   :  { %v1733_v62 = vpack.c.bf16 %v1731_v61, %v1731_v61 }
 0x2b9   :  { %1887 = vmatmul.bf16.vlgmr.msra.gmra.mxu0 %v1733_v62 }
 0x2ba   :  { %v1728_v14 = vpop.f32.mrf.mxu2 }
 0x336   :  { %v1888_v19 = vpop.f32.mrf.mxu0 }
 0x338   :  { %v1875_v32 = vpop.f32.mrf.mxu3 }
 0x339   :  { %v1876_v36 = vadd.f32 %v2933_v1, %v1875_v32 }
 0x33b   :  { %v1889_v63 = vadd.f32 %v1888_v19, %v1876_v36 }
 0x33d   :  { %1892 = vst [vmem:[#allocation20] sm:$0xff] %v1889_v63 }
 0x33e   :  { %v1890_v2 = vpop.f32.mrf.mxu0  ;;  %1903 = dma.vmem_to_hbm [thread:$0]  %s1899_s0, 128, %s1901_s24, [#allocation4]  }
 0x340   :  { %v1877_v0 = vpop.f32.mrf.mxu3 }
 0x341   :  { %3234 = dma.done.wait [#allocation4], 128  }
 0x342   :  { %3235 = vsyncadd [#allocation4], 4294967168 }
 0x343   :  { %1908 = vsyncpa [#allocation3], 1 }
 0x344   :  { %1909 = vsyncpa [#allocation6], 1 }
 0x345   :  { %1910 = vsyncpa [#allocation9], 1 }
 0x346   :  { %1911 = vsyncpa [#allocation12], 1 }
 0x347   :  { %1912 = vsyncpa [#allocation15], 1 }
 0x348   :  { %1913 = vsyncpa [#allocation18], 1 }
 0x349   :  { %1914 = vsyncpa [#allocation4], 1 }

</bundles_post_ra>
